<compile_context>
chip_gen: v7x
topology: tpu7x:2x2x1
jax: 0.10.0
libtpu: 0.0.40
codegen_flags: <defaults>
</compile_context>

<pallas_src>
import functools
import math

import jax
import jax.numpy as jnp
from jax import lax
from jax.experimental import pallas as pl
from jax.experimental.pallas import tpu as pltpu


# ------------------------------ in-kernel helpers ------------------------------

def _layer_norm(x, g, b, eps=1e-5):
    mu = jnp.mean(x, axis=-1, keepdims=True)
    var = jnp.mean((x - mu) ** 2, axis=-1, keepdims=True)
    return (x - mu) * lax.rsqrt(var + eps) * g + b


def _softmax(x, approx):
    m = jnp.max(x, axis=-1, keepdims=True)
    e = jnp.exp(x - m)
    s = jnp.sum(e, axis=-1, keepdims=True)
    if approx:
        # divide-free: exp (EUP) + approximate reciprocal (EUP) + VPU multiply
        return e * pl.reciprocal(s, approx=True)
    return e / s


def _gelu(x):
    # tanh-approximation GELU: transcendental work goes to the EUP slot instead of a
    # long VALU polynomial.  (nn.GELU() default is erf-exact; max abs dev ~1e-3.)
    c = 0.7978845608028654  # sqrt(2/pi)
    return 0.5 * x * (1.0 + jnp.tanh(c * (x + 0.044715 * x * x * x)))


def _round_up(n, m):
    return ((n + m - 1) // m) * m


def _vmem_limit_bytes():
    """Generation-aware VMEM limit: ~3/4 of physical (96 MiB v5e/v6e, 48 MiB v7x)."""
    try:
        info = pltpu.get_tpu_info()
        cap = getattr(info, "vmem_capacity_bytes", None)
        if cap:
            return int(cap) * 3 // 4
    except Exception:
        pass
    return 32 * 1024 * 1024  # conservative fallback, safe on every generation


# ---------------------------------- kernels ------------------------------------

def _attention_head_kernel(*refs, scale, has_mask, has_adj, E, dh):
    """Grid = (batch, head).  Computes one head's context for one batch element.

    LayerNorm1 and the fused QKV projection run once per batch element (head axis is the
    inner 'arbitrary' grid dim) and are cached in an (S, 3E) bf16 VMEM scratch.
    """
    it = iter(refs)
    x_ref = next(it)
    ln1g_ref = next(it)
    ln1b_ref = next(it)
    wqkv_ref = next(it)                          # (E, 3E) bf16, pinned
    bqkv_ref = next(it)                          # (1, 3E) f32, pinned
    mask_ref = next(it) if has_mask else None    # (S, S) bf16 (1 = masked)
    adj_ref = next(it) if has_adj else None      # (S, S) bf16
    ctx_ref = next(it)                           # output: (S, dh) lane slice, bf16
    qkv_ref = next(it)                           # VMEM scratch: (S, 3E) bf16 = [Q | K | V]

    # LayerNorm1 + fused QKV projection once per batch element.
    @pl.when(pl.program_id(1) == 0)
    def _():
        nx = _layer_norm(x_ref[...], ln1g_ref[...], ln1b_ref[...]).astype(jnp.bfloat16)
        qkv = jnp.dot(nx, wqkv_ref[...],
                      preferred_element_type=jnp.float32) + bqkv_ref[...]
        qkv_ref[...] = qkv.astype(jnp.bfloat16)

    h = pl.program_id(1)
    q_off = pl.multiple_of(h * dh, 128)
    k_off = pl.multiple_of(E + h * dh, 128)
    v_off = pl.multiple_of(2 * E + h * dh, 128)
    q = qkv_ref[:, pl.ds(q_off, dh)]                                  # (S, dh) bf16
    k = qkv_ref[:, pl.ds(k_off, dh)]
    v = qkv_ref[:, pl.ds(v_off, dh)]

    # (S, dh) x (S, dh)^T -> (S, S): bf16 operands, f32 accumulation on the MXU.
    # (Same contraction as the Pallas flash-attention reference; no explicit transpose.)
    logits = lax.dot_general(
        q, k, (((1,), (1,)), ((), ())),
        preferred_element_type=jnp.float32) * scale
    if has_mask:
        logits = logits + mask_ref[...].astype(jnp.float32) * (-1e9)
    attn = _softmax(logits, approx=True)
    if has_adj:
        attn = attn + adj_ref[...].astype(jnp.float32)
    attn = _softmax(attn, approx=False)   # second softmax is unconditional in the reference

    ctx = jnp.dot(attn.astype(jnp.bfloat16), v, preferred_element_type=jnp.float32)
    ctx_ref[...] = ctx.astype(jnp.bfloat16)


def _proj_ffn_kernel(x_ref, ctx_ref, wo_ref, bo_ref, ln2g_ref, ln2b_ref,
                     w1_ref, b1_ref, w2_ref, b2_ref, o_ref):
    """Grid tiled over tokens.  Single full-E output projection + residual + FFN."""
    attn_out = jnp.dot(ctx_ref[...], wo_ref[...],
                       preferred_element_type=jnp.float32) + bo_ref[...]
    x = x_ref[...] + attn_out                                         # residual 1 (f32)

    y = _layer_norm(x, ln2g_ref[...], ln2b_ref[...]).astype(jnp.bfloat16)
    h = _gelu(jnp.dot(y, w1_ref[...], preferred_element_type=jnp.float32) + b1_ref[...])
    ff = jnp.dot(h.astype(jnp.bfloat16), w2_ref[...],
                 preferred_element_type=jnp.float32) + b2_ref[...]
    o_ref[...] = x + ff                                               # residual 2


# ----------------------------- pallas_call wrappers -----------------------------

def _pin(shape):
    """BlockSpec for a weight pinned across the grid (constant block index)."""
    # TODO(synk): on v7x, pipeline_mode=pl.Buffered(1) on these invariant blocks would halve
    # their resident VMEM footprint at zero perf cost; left off pending support validation.
    return pl.BlockSpec(shape, lambda *_: (0,) * len(shape))


def _multi_head_attention_ctx(x, p, head, mask_bf16, adj_bf16, vmem_limit):
    """Returns the concatenated per-head contexts (B, S, E) in bf16."""
    B, S, E = x.shape
    assert E % head == 0
    dh = E // head
    # per-head lane blocks must satisfy the (8, 128) tiling constraint
    assert dh % 128 == 0, "head_dim must be a multiple of 128 for lane-aligned head blocks"
    scale = 1.0 / math.sqrt(dh)
    has_mask = mask_bf16 is not None
    has_adj = adj_bf16 is not None

    args = [x, p['ln1_g'], p['ln1_b'], p['wqkv'], p['bqkv']]
    in_specs = [
        pl.BlockSpec((None, S, E), lambda b, h: (b, 0, 0)),   # x_b, resident across heads
        _pin((1, E)), _pin((1, E)),                           # LN1 gamma / beta
        _pin((E, 3 * E)), _pin((1, 3 * E)),                   # fused Wqkv / bqkv
    ]
    if has_mask:
        args.append(mask_bf16)
        in_specs.append(pl.BlockSpec((None, S, S), lambda b, h: (b, 0, 0)))
    if has_adj:
        args.append(adj_bf16)
        in_specs.append(pl.BlockSpec((None, S, S), lambda b, h: (b, 0, 0)))

    # TODO(synk): for large S, block the K/V axis (flash-style online softmax) instead of
    # materializing the full (S, S) logits/attn tiles (v7x 64 MiB VMEM at S >= 2048).
    return pl.pallas_call(
        functools.partial(_attention_head_kernel, scale=scale,
                          has_mask=has_mask, has_adj=has_adj, E=E, dh=dh),
        grid=(B, head),
        in_specs=in_specs,
        out_specs=pl.BlockSpec((None, S, dh), lambda b, h: (b, 0, h)),
        out_shape=jax.ShapeDtypeStruct((B, S, E), jnp.bfloat16),
        scratch_shapes=[pltpu.VMEM((S, 3 * E), jnp.bfloat16)],   # cached [Q | K | V]
        compiler_params=pltpu.CompilerParams(
            dimension_semantics=("parallel", "arbitrary"),
            vmem_limit_bytes=vmem_limit),
    )(*args)


def _attn_out_and_ffn(x2, ctx2, p, vmem_limit):
    """Output projection + residual + FFN block, token-tiled (padded to the tile)."""
    N, E = x2.shape
    F = p['w1'].shape[1]

    # largest lane/sublane-aligned token tile up to 512; pad N so the grid divides evenly
    tm = min(512, _round_up(N, 128))
    n_pad = _round_up(N, tm)
    if n_pad != N:
        x2 = jnp.pad(x2, ((0, n_pad - N), (0, 0)))
        ctx2 = jnp.pad(ctx2, ((0, n_pad - N), (0, 0)))

    tok = lambda i: (i, 0)
    out = pl.pallas_call(
        _proj_ffn_kernel,
        grid=(n_pad // tm,),
        in_specs=[
            pl.BlockSpec((tm, E), tok),      # residual stream x (f32)
            pl.BlockSpec((tm, E), tok),      # concat(heads) context (bf16)
            _pin((E, E)), _pin((1, E)),      # Wo, bo
            _pin((1, E)), _pin((1, E)),      # LN2 gamma / beta
            _pin((E, F)), _pin((1, F)),      # W1, b1
            _pin((F, E)), _pin((1, E)),      # W2, b2
        ],
        out_specs=pl.BlockSpec((tm, E), tok),
        out_shape=jax.ShapeDtypeStruct((n_pad, E), jnp.float32),
        compiler_params=pltpu.CompilerParams(
            dimension_semantics=("parallel",),
            vmem_limit_bytes=vmem_limit),
    )(x2, ctx2, p['wo'], p['bo'], p['ln2_g'], p['ln2_b'],
      p['w1'], p['b1'], p['w2'], p['b2'])
    return out[:N] if n_pad != N else out


def transformer_encoder_layer(x, params, *, head, mask=None, gnn_adj=None,
                              dist_score=None):
    """Pre-norm TransformerEncoderLayer.forward (norm_first=True, eval-mode dropout).

    Returns (x_out, dist_score_raw); dist_score must be None.
    """
    # TODO(synk): dist_score path (self.dist_block — a full post-norm torch
    # TransformerEncoderLayer applied to dist_score) is not implemented.
    assert dist_score is None
    # TODO(synk): norm_first=False (post-norm) branch not implemented.
    B, S, E = x.shape
    x = x.astype(jnp.float32)                       # residual stream kept in f32
    # mask / adj streamed in bf16 (exact for 0/1-valued tensors); mask * -1e9 applied
    # in-kernel in f32, matching the PyTorch additive semantics.
    mask_bf16 = None if mask is None else mask.astype(jnp.bfloat16)
    adj_bf16 = None if gnn_adj is None else gnn_adj.astype(jnp.bfloat16)

    vmem_limit = _vmem_limit_bytes()
    ctx = _multi_head_attention_ctx(x, params, head, mask_bf16, adj_bf16,
                                    vmem_limit)                       # (B, S, E) bf16

    out2 = _attn_out_and_ffn(x.reshape(B * S, E), ctx.reshape(B * S, E),
                             params, vmem_limit)
    return out2.reshape(B, S, E), None


# ------------------------------- parameter setup --------------------------------

def init_encoder_layer_params(key, embed_dim, ffn):
    """PyTorch-style Linear init; matmul weights stored as (in, out) in bf16.

    Q/K/V projection weights are fused into a single (E, 3E) bf16 weight / (1, 3E) f32 bias.
    """
    def linear(k, fin, fout):
        kw, kb = jax.random.split(k)
        lim = 1.0 / math.sqrt(fin)
        w = jax.random.uniform(kw, (fin, fout), jnp.float32, -lim, lim).astype(jnp.bfloat16)
        b = jax.random.uniform(kb, (1, fout), jnp.float32, -lim, lim)
        return w, b

    ks = jax.random.split(key, 6)
    wq, bq = linear(ks[0], embed_dim, embed_dim)
    wk, bk = linear(ks[1], embed_dim, embed_dim)
    wv, bv = linear(ks[2], embed_dim, embed_dim)
    wo, bo = linear(ks[3], embed_dim, embed_dim)
    w1, b1 = linear(ks[4], embed_dim, ffn)
    w2, b2 = linear(ks[5], ffn, embed_dim)
    # TODO(synk): self.dist_block parameters (unused when dist_score is None) not created.
    return dict(
        ln1_g=jnp.ones((1, embed_dim), jnp.float32),
        ln1_b=jnp.zeros((1, embed_dim), jnp.float32),
        ln2_g=jnp.ones((1, embed_dim), jnp.float32),
        ln2_b=jnp.zeros((1, embed_dim), jnp.float32),
        wqkv=jnp.concatenate([wq, wk, wv], axis=1),
        bqkv=jnp.concatenate([bq, bk, bv], axis=1),
        wo=wo, bo=bo, w1=w1, b1=b1, w2=w2, b2=b2)


# ------------------------------------ main ---------------------------------------

if __name__ == "__main__":
    # small but lane-aligned shapes: dh = E / HEAD = 128, S multiple of 8/128
    B, S, E, HEAD, FFN = 2, 128, 256, 2, 512

    root = jax.random.PRNGKey(0)
    kp, kx, km, kg = jax.random.split(root, 4)

    params = init_encoder_layer_params(kp, E, FFN)
    x = jax.random.normal(kx, (B, S, E), jnp.float32)
    mask = (jax.random.uniform(km, (B, S, S)) < 0.1).astype(jnp.float32)      # 1 = masked
    gnn_adj = (jax.random.uniform(kg, (B, S, S)) < 0.3).astype(jnp.float32)

    out, dist_raw = transformer_encoder_layer(x, params, head=HEAD,
                                              mask=mask, gnn_adj=gnn_adj,
                                              dist_score=None)
    jax.block_until_ready(out)
    assert out.shape == (B, S, E)
    assert bool(jnp.all(jnp.isfinite(out)))
    print("KERNEL_OK")
</pallas_src>

<mosaic_0001>
module attributes {stable_mosaic.version = 11 : i64} {
  func.func @_attention_head_kernel(%arg0: i32, %arg1: i32, %arg2: memref<1x128x256xf32, #tpu.memory_space<vmem>>, %arg3: memref<1x256xf32, #tpu.memory_space<vmem>>, %arg4: memref<1x256xf32, #tpu.memory_space<vmem>>, %arg5: memref<256x768xbf16, #tpu.memory_space<vmem>>, %arg6: memref<1x768xf32, #tpu.memory_space<vmem>>, %arg7: memref<1x128x128xbf16, #tpu.memory_space<vmem>>, %arg8: memref<1x128x128xbf16, #tpu.memory_space<vmem>>, %arg9: memref<1x128x128xbf16, #tpu.memory_space<vmem>>, %arg10: memref<128x768xbf16, #tpu.memory_space<vmem>>) attributes {dimension_semantics = [#tpu.dimension_semantics<parallel>, #tpu.dimension_semantics<arbitrary>], iteration_bounds = array<i64: 2, 2>, scalar_prefetch = 0 : i64, scratch_operands = 1 : i64, tpu.core_type = #tpu.core_type<tc>, window_params = [{transform_indices = @transform_0, window_bounds = array<i64: 1, 128, 256>}, {pipeline_mode = #tpu.pipeline_mode<synchronous>, transform_indices = @transform_1, window_bounds = array<i64: 1, 256>}, {pipeline_mode = #tpu.pipeline_mode<synchronous>, transform_indices = @transform_2, window_bounds = array<i64: 1, 256>}, {pipeline_mode = #tpu.pipeline_mode<synchronous>, transform_indices = @transform_3, window_bounds = array<i64: 256, 768>}, {pipeline_mode = #tpu.pipeline_mode<synchronous>, transform_indices = @transform_4, window_bounds = array<i64: 1, 768>}, {transform_indices = @transform_5, window_bounds = array<i64: 1, 128, 128>}, {transform_indices = @transform_6, window_bounds = array<i64: 1, 128, 128>}, {transform_indices = @transform_7, window_bounds = array<i64: 1, 128, 128>}]} {
    %c0_i32 = arith.constant 0 : i32
    %0 = arith.cmpi eq, %arg1, %c0_i32 : i32
    %1 = arith.extui %0 : i1 to i32
    %c0_i32_0 = arith.constant 0 : i32
    %2 = arith.cmpi ne, %1, %c0_i32_0 : i32
    scf.if %2 {
      %c0_21 = arith.constant 0 : index
      %c0_22 = arith.constant 0 : index
      %c0_23 = arith.constant 0 : index
      %55 = vector.load %arg2[%c0_21, %c0_22, %c0_23] : memref<1x128x256xf32, #tpu.memory_space<vmem>>, vector<1x128x256xf32>
      %56 = vector.shape_cast %55 : vector<1x128x256xf32> to vector<128x256xf32>
      %c0_24 = arith.constant 0 : index
      %c0_25 = arith.constant 0 : index
      %57 = vector.load %arg3[%c0_24, %c0_25] : memref<1x256xf32, #tpu.memory_space<vmem>>, vector<1x256xf32>
      %c0_26 = arith.constant 0 : index
      %c0_27 = arith.constant 0 : index
      %58 = vector.load %arg4[%c0_26, %c0_27] : memref<1x256xf32, #tpu.memory_space<vmem>>, vector<1x256xf32>
      %cst_28 = arith.constant dense<0.000000e+00> : vector<128xf32>
      %59 = vector.multi_reduction <add>, %56, %cst_28 [1] : vector<128x256xf32> to vector<128xf32>
      %60 = vector.shape_cast %59 : vector<128xf32> to vector<128x1xf32>
      %cst_29 = arith.constant 2.560000e+02 : f32
      %61 = vector.broadcast %cst_29 : f32 to vector<128x1xf32>
      %62 = arith.divf %60, %61 : vector<128x1xf32>
      %63 = vector.broadcast %62 : vector<128x1xf32> to vector<128x256xf32>
      %64 = arith.subf %56, %63 : vector<128x256xf32>
      %65 = arith.mulf %64, %64 : vector<128x256xf32>
      %cst_30 = arith.constant dense<0.000000e+00> : vector<128xf32>
      %66 = vector.multi_reduction <add>, %65, %cst_30 [1] : vector<128x256xf32> to vector<128xf32>
      %67 = vector.shape_cast %66 : vector<128xf32> to vector<128x1xf32>
      %cst_31 = arith.constant 2.560000e+02 : f32
      %68 = vector.broadcast %cst_31 : f32 to vector<128x1xf32>
      %69 = arith.divf %67, %68 : vector<128x1xf32>
      %70 = vector.broadcast %62 : vector<128x1xf32> to vector<128x256xf32>
      %71 = arith.subf %56, %70 : vector<128x256xf32>
      %cst_32 = arith.constant 9.99999974E-6 : f32
      %72 = vector.broadcast %cst_32 : f32 to vector<128x1xf32>
      %73 = arith.addf %69, %72 : vector<128x1xf32>
      %74 = math.rsqrt %73 : vector<128x1xf32>
      %75 = vector.broadcast %74 : vector<128x1xf32> to vector<128x256xf32>
      %76 = arith.mulf %71, %75 : vector<128x256xf32>
      %77 = vector.broadcast %57 : vector<1x256xf32> to vector<128x256xf32>
      %78 = arith.mulf %76, %77 : vector<128x256xf32>
      %79 = vector.broadcast %58 : vector<1x256xf32> to vector<128x256xf32>
      %80 = arith.addf %78, %79 : vector<128x256xf32>
      %81 = arith.truncf %80 : vector<128x256xf32> to vector<128x256xbf16>
      %c0_33 = arith.constant 0 : index
      %c0_34 = arith.constant 0 : index
      %82 = vector.load %arg5[%c0_33, %c0_34] : memref<256x768xbf16, #tpu.memory_space<vmem>>, vector<256x768xbf16>
      %cst_35 = arith.constant dense<0.000000e+00> : vector<128x768xf32>
      %83 = tpu.matmul %81, %82, %cst_35 {dimension_numbers = #tpu.dot_dimension_numbers<[1], [0], [0], [1], [0, 0, 1, 1], [], []>} : vector<128x256xbf16>, vector<256x768xbf16>, vector<128x768xf32> -> vector<128x768xf32>
      %c0_36 = arith.constant 0 : index
      %c0_37 = arith.constant 0 : index
      %84 = vector.load %arg6[%c0_36, %c0_37] : memref<1x768xf32, #tpu.memory_space<vmem>>, vector<1x768xf32>
      %85 = vector.broadcast %84 : vector<1x768xf32> to vector<128x768xf32>
      %86 = arith.addf %83, %85 : vector<128x768xf32>
      %87 = arith.truncf %86 : vector<128x768xf32> to vector<128x768xbf16>
      %c0_38 = arith.constant 0 : index
      %c0_39 = arith.constant 0 : index
      %88 = vector.load %arg10[%c0_38, %c0_39] : memref<128x768xbf16, #tpu.memory_space<vmem>>, vector<128x768xbf16>
      tpu.vector_store %arg10[%c0_38, %c0_39], %87 {strides = array<i32>} : memref<128x768xbf16, #tpu.memory_space<vmem>>, vector<128x768xbf16>,
    } else {
    }
    %c128_i32 = arith.constant 128 : i32
    %3 = arith.muli %arg1, %c128_i32 : i32
    %4 = tpu.assume_multiple %3, 128 : i32
    %c128_i32_1 = arith.constant 128 : i32
    %5 = arith.muli %arg1, %c128_i32_1 : i32
    %c256_i32 = arith.constant 256 : i32
    %6 = arith.addi %c256_i32, %5 : i32
    %7 = tpu.assume_multiple %6, 128 : i32
    %c128_i32_2 = arith.constant 128 : i32
    %8 = arith.muli %arg1, %c128_i32_2 : i32
    %c512_i32 = arith.constant 512 : i32
    %9 = arith.addi %c512_i32, %8 : i32
    %10 = tpu.assume_multiple %9, 128 : i32
    %c0 = arith.constant 0 : index
    %11 = arith.index_cast %4 : i32 to index
    %12 = vector.load %arg10[%c0, %11] : memref<128x768xbf16, #tpu.memory_space<vmem>>, vector<128x128xbf16>
    %c0_3 = arith.constant 0 : index
    %13 = arith.index_cast %7 : i32 to index
    %14 = vector.load %arg10[%c0_3, %13] : memref<128x768xbf16, #tpu.memory_space<vmem>>, vector<128x128xbf16>
    %c0_4 = arith.constant 0 : index
    %15 = arith.index_cast %10 : i32 to index
    %16 = vector.load %arg10[%c0_4, %15] : memref<128x768xbf16, #tpu.memory_space<vmem>>, vector<128x128xbf16>
    %cst = arith.constant dense<0.000000e+00> : vector<128x128xf32>
    %17 = tpu.matmul %12, %14, %cst {dimension_numbers = #tpu.dot_dimension_numbers<[1], [1], [0], [0], [0, 0, 1, 0], [], []>} : vector<128x128xbf16>, vector<128x128xbf16>, vector<128x128xf32> -> vector<128x128xf32>
    %cst_5 = arith.constant 0.0883883461 : f32
    %18 = vector.broadcast %cst_5 : f32 to vector<128x128xf32>
    %19 = arith.mulf %17, %18 : vector<128x128xf32>
    %c0_6 = arith.constant 0 : index
    %c0_7 = arith.constant 0 : index
    %c0_8 = arith.constant 0 : index
    %20 = vector.load %arg7[%c0_6, %c0_7, %c0_8] : memref<1x128x128xbf16, #tpu.memory_space<vmem>>, vector<1x128x128xbf16>
    %21 = vector.shape_cast %20 : vector<1x128x128xbf16> to vector<128x128xbf16>
    %22 = arith.extf %21 : vector<128x128xbf16> to vector<128x128xf32>
    %cst_9 = arith.constant -1.000000e+09 : f32
    %23 = vector.broadcast %cst_9 : f32 to vector<128x128xf32>
    %24 = arith.mulf %22, %23 : vector<128x128xf32>
    %25 = arith.addf %19, %24 : vector<128x128xf32>
    %cst_10 = arith.constant dense<0xFF800000> : vector<128xf32>
    %26 = vector.multi_reduction <maximumf>, %25, %cst_10 [1] : vector<128x128xf32> to vector<128xf32>
    %27 = vector.shape_cast %26 : vector<128xf32> to vector<128x1xf32>
    %28 = vector.broadcast %27 : vector<128x1xf32> to vector<128x128xf32>
    %29 = arith.subf %25, %28 : vector<128x128xf32>
    %30 = math.exp %29 : vector<128x128xf32>
    %cst_11 = arith.constant dense<0.000000e+00> : vector<128xf32>
    %31 = vector.multi_reduction <add>, %30, %cst_11 [1] : vector<128x128xf32> to vector<128xf32>
    %32 = vector.shape_cast %31 : vector<128xf32> to vector<128x1xf32>
    %33 = tpu.reciprocal %32 {approx = true} : vector<128x1xf32> -> vector<128x1xf32>
    %34 = vector.broadcast %33 : vector<128x1xf32> to vector<128x128xf32>
    %35 = arith.mulf %30, %34 : vector<128x128xf32>
    %c0_12 = arith.constant 0 : index
    %c0_13 = arith.constant 0 : index
    %c0_14 = arith.constant 0 : index
    %36 = vector.load %arg8[%c0_12, %c0_13, %c0_14] : memref<1x128x128xbf16, #tpu.memory_space<vmem>>, vector<1x128x128xbf16>
    %37 = vector.shape_cast %36 : vector<1x128x128xbf16> to vector<128x128xbf16>
    %38 = arith.extf %37 : vector<128x128xbf16> to vector<128x128xf32>
    %39 = arith.addf %35, %38 : vector<128x128xf32>
    %cst_15 = arith.constant dense<0xFF800000> : vector<128xf32>
    %40 = vector.multi_reduction <maximumf>, %39, %cst_15 [1] : vector<128x128xf32> to vector<128xf32>
    %41 = vector.shape_cast %40 : vector<128xf32> to vector<128x1xf32>
    %42 = vector.broadcast %41 : vector<128x1xf32> to vector<128x128xf32>
    %43 = arith.subf %39, %42 : vector<128x128xf32>
    %44 = math.exp %43 : vector<128x128xf32>
    %cst_16 = arith.constant dense<0.000000e+00> : vector<128xf32>
    %45 = vector.multi_reduction <add>, %44, %cst_16 [1] : vector<128x128xf32> to vector<128xf32>
    %46 = vector.shape_cast %45 : vector<128xf32> to vector<128x1xf32>
    %47 = vector.broadcast %46 : vector<128x1xf32> to vector<128x128xf32>
    %48 = arith.divf %44, %47 : vector<128x128xf32>
    %49 = arith.truncf %48 : vector<128x128xf32> to vector<128x128xbf16>
    %cst_17 = arith.constant dense<0.000000e+00> : vector<128x128xf32>
    %50 = tpu.matmul %49, %16, %cst_17 {dimension_numbers = #tpu.dot_dimension_numbers<[1], [0], [0], [1], [0, 0, 1, 1], [], []>} : vector<128x128xbf16>, vector<128x128xbf16>, vector<128x128xf32> -> vector<128x128xf32>
    %51 = arith.truncf %50 : vector<128x128xf32> to vector<128x128xbf16>
    %c0_18 = arith.constant 0 : index
    %c0_19 = arith.constant 0 : index
    %c0_20 = arith.constant 0 : index
    %52 = vector.load %arg9[%c0_18, %c0_19, %c0_20] : memref<1x128x128xbf16, #tpu.memory_space<vmem>>, vector<1x128x128xbf16>
    %53 = vector.shape_cast %52 : vector<1x128x128xbf16> to vector<128x128xbf16>
    %54 = vector.shape_cast %51 : vector<128x128xbf16> to vector<1x128x128xbf16>
    tpu.vector_store %arg9[%c0_18, %c0_19, %c0_20], %54 {strides = array<i32>} : memref<1x128x128xbf16, #tpu.memory_space<vmem>>, vector<1x128x128xbf16>,
    return
  }
  func.func @transform_0(%arg0: i32, %arg1: i32) -> (i32, i32, i32) {
    %c0_i32 = arith.constant 0 : i32
    %c0_i32_0 = arith.constant 0 : i32
    %c0_i32_1 = arith.constant 0 : i32
    return %arg0, %c0_i32, %c0_i32_0 : i32, i32, i32
  }
  func.func @transform_1(%arg0: i32, %arg1: i32) -> (i32, i32) {
    %c0_i32 = arith.constant 0 : i32
    %c0_i32_0 = arith.constant 0 : i32
    %c0_i32_1 = arith.constant 0 : i32
    return %c0_i32, %c0_i32_0 : i32, i32
  }
  func.func @transform_2(%arg0: i32, %arg1: i32) -> (i32, i32) {
    %c0_i32 = arith.constant 0 : i32
    %c0_i32_0 = arith.constant 0 : i32
    %c0_i32_1 = arith.constant 0 : i32
    return %c0_i32, %c0_i32_0 : i32, i32
  }
  func.func @transform_3(%arg0: i32, %arg1: i32) -> (i32, i32) {
    %c0_i32 = arith.constant 0 : i32
    %c0_i32_0 = arith.constant 0 : i32
    %c0_i32_1 = arith.constant 0 : i32
    return %c0_i32, %c0_i32_0 : i32, i32
  }
  func.func @transform_4(%arg0: i32, %arg1: i32) -> (i32, i32) {
    %c0_i32 = arith.constant 0 : i32
    %c0_i32_0 = arith.constant 0 : i32
    %c0_i32_1 = arith.constant 0 : i32
    return %c0_i32, %c0_i32_0 : i32, i32
  }
  func.func @transform_5(%arg0: i32, %arg1: i32) -> (i32, i32, i32) {
    %c0_i32 = arith.constant 0 : i32
    %c0_i32_0 = arith.constant 0 : i32
    %c0_i32_1 = arith.constant 0 : i32
    return %arg0, %c0_i32, %c0_i32_0 : i32, i32, i32
  }
  func.func @transform_6(%arg0: i32, %arg1: i32) -> (i32, i32, i32) {
    %c0_i32 = arith.constant 0 : i32
    %c0_i32_0 = arith.constant 0 : i32
    %c0_i32_1 = arith.constant 0 : i32
    return %arg0, %c0_i32, %c0_i32_0 : i32, i32, i32
  }
  func.func @transform_7(%arg0: i32, %arg1: i32) -> (i32, i32, i32) {
    %c0_i32 = arith.constant 0 : i32
    %c0_i32_0 = arith.constant 0 : i32
    return %arg0, %c0_i32, %arg1 : i32, i32, i32
  }
}

</mosaic_0001>

<bundles_post_ra>
// kernel: tpu_custom_call.1
= control target key start
LH: loop header
LB: loop body
LE: loop exit
PB: predicated region body
PF: predicated region fallthrough
CT: control target
= control target key end

     0   :  { %s5167_s0 = inlined_call_operand.hbm [shape: f32[2,128,256], index: 0, kind: input, shape index: {}]   ;;  %s5168_s1 = inlined_call_operand.vmem [shape: f32[1,256], index: 1, kind: input, shape index: {}]   ;;  %s5169_s2 = inlined_call_operand.vmem [shape: f32[1,256], index: 2, kind: input, shape index: {}]   ;;  %s5170_s3 = inlined_call_operand.hbm [shape: bf16[256,768], index: 3, kind: input, shape index: {}]   ;;  %s5171_s4 = inlined_call_operand.vmem [shape: f32[1,768], index: 4, kind: input, shape index: {}]   ;;  %s5172_s5 = inlined_call_operand.hbm [shape: bf16[2,128,128], index: 5, kind: input, shape index: {}]   ;;  %s5173_s6 = inlined_call_operand.hbm [shape: bf16[2,128,128], index: 6, kind: input, shape index: {}]   ;;  %s5174_s7 = inlined_call_operand.hbm [shape: bf16[2,128,256], index: 7, kind: output, shape index: {}]  }
   0x1   :  { %5191 = sst [smem:[#allocation24_spill]] %s5167_s0 }
   0x2   :  { %5192 = sst [smem:[#allocation25_spill]] %s5171_s4 }
   0x3   :  { %5193 = sst [smem:[#allocation26_spill]] %s5172_s5 }
   0x4   :  { %5194 = sst [smem:[#allocation27_spill]] %s5174_s7 }
   0x5   :  { %12 = vsyncpa [#allocation4], 0 }
   0x6   :  { %14 = vsyncpa [#allocation4 + $0x1], 0 }
   0x7   :  { %15 = vsyncpa [#allocation7], 0 }
   0x8   :  { %16 = vsyncpa [#allocation5], 0 }
   0x9   :  { %18 = vsyncpa [#allocation5 + $0x1], 0  ;;  %s3889_s24 = smov 0   ;;  %s3891_s25 = smov 0  }
   0xa   :  { %s3893_s26 = smov 0   ;;  %s3895_s27 = smov 0  }
   0xb   :  { %s3897_s28 = smov 0   ;;  %s3899_s29 = smov 0  }
   0xc   :  { %s3901_s30 = smov 0   ;;  %s3903_s8 = smov 0  }
   0xd   :  { %s3905_s9 = smov 0   ;;  %s3907_s10 = smov 0  }
   0xe   :  { %s3909_s11 = smov 0  }
   0xf LB: > { %5195 = sst [smem:[#allocation15_spill]] %s3801_s26  ;;  %s33_s12 = sadd.s32 1, %s3825_s9  ;;  %s3833_s11 = sphi %s3909_s11, %s24_s11   ;;  %s3829_s10 = sphi %s3907_s10, %s5241_s10   ;;  %s3825_s9 = sphi %s3905_s9, %s5234_s9   ;;  %s3821_s8 = sphi %s3903_s8, %s5240_s8   ;;  %s3817_s30 = sphi %s3901_s30, %s5233_s30   ;;  %s3813_s29 = sphi %s3899_s29, %s5232_s29   ;;  %s3809_s28 = sphi %s3897_s28, %s5239_s28   ;;  %s3805_s27 = sphi %s3895_s27, %s5238_s27   ;;  %s3801_s26 = sphi %s3893_s26, %s5230_s26   ;;  %s3797_s25 = sphi %s3891_s25, %s5237_s25   ;;  %s3793_s24 = sphi %s3889_s24, %s5236_s24  }
  0x10   : > { %5196 = sst [smem:[#allocation16_spill]] %s3813_s29  ;;  %s36_s13 = sadd.s32 1, %s3829_s10 }
  0x11   : > { %5197 = sst [smem:[#allocation17_spill]] %s3821_s8  ;;  %p34_p0 = scmp.ge.s32.totalorder %s33_s12, 2 }
  0x12   : > { %5198 = sst [smem:[#allocation18_spill]] %s3825_s9  ;;  %s43_s14 = sadd.s32 1, %s3813_s29 }
  0x13   : > { %p50_p1 = scmp.ne.s32.totalorder %s3813_s29, %s3809_s28  ;;  %p51_p2 = scmp.eq.s32.totalorder %s3833_s11, 0 }
  0x14   : > { %s5243_s12 = smov (%p34_p0, %s33_s12), 0  ;;  %s5245_s13 = smov (!%p34_p0, %s36_s13), %s3829_s10 }
  0x15   : > { %5199 = sst [smem:[#allocation19_spill]] %s5243_s12  ;;  %p3953_p3 = por %p51_p2, %p50_p1 }
  0x16   : > { %s203_s16 = ssub.s32 %s3825_s9, %s5243_s12  ;;  %p38_p4 = scmp.ge.s32.totalorder %s5245_s13, 2 }
  0x17   : > { %p3180_p5 = scmp.lt.s32.totalorder %s3833_s11, 4  ;;  %s266_s17 = sand.u32 1, %s3833_s11  }
  0x18   : > { %s5247_s13 = smov (%p38_p4, %s5245_s13), 0  ;;  %s268_s18 = sand.u32 1, %s3813_s29  }
  0x19   : > { %5201 = sst [smem:[#allocation20_spill]] %s5247_s13  ;;  %s40_s19 = ssub.s32 %s3829_s10, %s5247_s13 }
  0x1a   : > { %s2740_s20 = sshll.u32 %s268_s18, 8  ;;  %p41_p6 = scmp.eq.s32.totalorder %s40_s19, 0 }
  0x1b   : > { %s3966_s21 = sor.u32 %s203_s16, %s40_s19  ;;  %s2877_s23 = sshll.u32 %s3829_s10, 12 }
  0x1c   : > { %s3970_s22 = scalar_select %p41_p6, %s3813_s29, %s43_s14  }
  0x1d   : > { %s270_s12 = scalar_lea.vmem [#allocation3], %s2740_s20  ;;  %s5203_s0 = sld [smem:[#allocation24_spill]] }
  0x1e   : > { %5202 = sst [smem:[#allocation21_spill]] %s3970_s22  ;;  %s277_s9 = sshll.u32 %s270_s12, 4  ;;  %s3978_s9 = int_to_ptr.vmem [resolvable:$true] %s277_s9 }
  0x1f   : > { %p3984_p8 = pnand %p3180_p5, %p3953_p3  ;;  %s3988_s14 = sshll.u32 %s268_s18, 6 }
  0x20   : > { %s3990_s12 = scalar_lea.sflag [#allocation4], %s266_s17 }
  0x21   : > { %s5204_s16 = scalar_select %p3984_p8, 1, 0 }
  0x22   : > { %p3996_p10 = pneg %p3984_p8 }
  0x23   : > { %s3976_s4 = scalar_lea.hbm %s5203_s0, %s2877_s23  ;;  %s3590_s20 = scalar_lea.hbm %s5203_s0, 8192 }
  0x24   : > { %s3585_s7 = scalar_lea.hbm %s3976_s4, 4096  ;;  %p3591_p13 = scmp.lt.u32.totalorder %s3976_s4, %s5203_s0 }
  0x25   : > { %p3586_p9 = scmp.ne.s32.totalorder %s3976_s4, %s3585_s7  ;;  %p3592_p0 = scmp.lt.u32.totalorder %s3590_s20, %s3585_s7 }
  0x26   : > { %s5205_s8 = scalar_select %p3996_p10, 1, 0 }
  0x27   : > { %p3588_p11 = pnand %p3996_p10, %p3586_p9  ;;  %p3593_p1 = por %p3592_p0, %p3591_p13 }
  0x28   : > { %p3594_p2 = scmp.lt.u32.totalorder %s3585_s7, %s3976_s4 }
  0x29   : > { %p3589_p12 = pneg %p3588_p11 }
  0x2a   : > { %p3595_p3 = por %p3594_p2, %p3593_p1 }
  0x2c   : > { %p3596_p4 = pnand %p3595_p3, %p3589_p12 }
  0x2e   : > { %3599 = shalt.err (!%p3596_p4)
}
  0x2f   : > { %s3600_s17 = scalar_lea.vmem %s3978_s9, 4096  ;;  %s3835_s15 = smov [#allocation3]  }
  0x30   : > { %p3601_p5 = scmp.ne.s32.totalorder %s3978_s9, %s3600_s17  ;;  %s3605_s19 = sshll.u32 %s3835_s15, 4  ;;  %s3606_s19 = int_to_ptr.vmem [resolvable:$false] %s3605_s19 }
  0x31   : > { %s3607_s23 = scalar_lea.vmem %s3606_s19, 8192  ;;  %p3608_p11 = scmp.lt.s32.totalorder %s3978_s9, %s3606_s19 }
  0x32   : > { %p3603_p6 = pnand %p3601_p5, %p3996_p10  ;;  %p3609_p7 = scmp.lt.s32.totalorder %s3607_s23, %s3600_s17 }
  0x34   : > { %p3604_p9 = pneg %p3603_p6  ;;  %p3610_p13 = por %p3609_p7, %p3608_p11 }
  0x36   : > { %p3611_p0 = pnand %p3610_p13, %p3604_p9 }
  0x38   : > { %3614 = shalt.err (!%p3611_p0)
}
  0x39   : > { %s3836_s7 = smov 256   ;;  %s3837_s20 = smov 16  }
  0x3a   : > { %3168 = dma.hbm_to_vmem [thread:$0]  (!%p3984_p8), %s3976_s4, 4096, %s3978_s9, %s3990_s12, %s3836_s7, %s3836_s7, %s3837_s20  }
  0x3b   : > { %s2878_s18 = sshll.u32 %s3829_s10, 10  ;;  %s291_s15 = scalar_lea.vmem [#allocation8], %s3988_s14 }
  0x3c   : > { %s298_s0 = sshll.u32 %s291_s15, 4  ;;  %s5206_s5 = sld [smem:[#allocation26_spill]]  ;;  %s4029_s0 = int_to_ptr.vmem [resolvable:$true] %s298_s0 }
  0x42   : > { %s4027_s23 = scalar_lea.hbm %s5206_s5, %s2878_s18  ;;  %s3620_s7 = scalar_lea.hbm %s5206_s5, 2048 }
  0x43   : > { %s3615_s13 = scalar_lea.hbm %s4027_s23, 1024  ;;  %p3621_p2 = scmp.lt.u32.totalorder %s4027_s23, %s5206_s5 }
  0x44   : > { %p3616_p7 = scmp.ne.s32.totalorder %s4027_s23, %s3615_s13  ;;  %p3622_p3 = scmp.lt.u32.totalorder %s3620_s7, %s3615_s13 }
  0x45   : > { %p3624_p5 = scmp.lt.u32.totalorder %s3615_s13, %s4027_s23 }
  0x46   : > { %p3618_p12 = pnand %p3616_p7, %p3996_p10  ;;  %p3623_p4 = por %p3622_p3, %p3621_p2 }
  0x48   : > { %p3619_p1 = pneg %p3618_p12  ;;  %p3625_p6 = por %p3624_p5, %p3623_p4 }
  0x4a   : > { %p3626_p9 = pnand %p3625_p6, %p3619_p1 }
  0x4c   : > { %3629 = shalt.err (!%p3626_p9)
}
  0x4d   : > { %s3630_s17 = scalar_lea.vmem %s4029_s0, 1024  ;;  %s3838_s19 = smov [#allocation8]  }
  0x4e   : > { %p3631_p11 = scmp.ne.s32.totalorder %s4029_s0, %s3630_s17  ;;  %s3635_s4 = sshll.u32 %s3838_s19, 4  ;;  %s3636_s4 = int_to_ptr.vmem [resolvable:$false] %s3635_s4 }
  0x4f   : > { %s3637_s9 = scalar_lea.vmem %s3636_s4, 2048  ;;  %p3638_p7 = scmp.lt.s32.totalorder %s4029_s0, %s3636_s4 }
  0x50   : > { %p3633_p13 = pnand %p3631_p11, %p3996_p10  ;;  %p3639_p12 = scmp.lt.s32.totalorder %s3637_s9, %s3630_s17 }
  0x52   : > { %p3634_p0 = pneg %p3633_p13  ;;  %p3640_p2 = por %p3639_p12, %p3638_p7 }
  0x54   : > { %p3641_p3 = pnand %p3640_p2, %p3634_p0 }
  0x56   : > { %3644 = shalt.err (!%p3641_p3)
}
  0x57   : > { %s5179_s13 = smov 64   ;;  %s5180_s7 = smov 4  }
  0x58   : > { %3171 = dma.hbm_to_vmem [thread:$0]  (!%p3984_p8), %s4027_s23, 1024, %s4029_s0, %s3990_s12, %s5179_s13, %s5179_s13, %s5180_s7  }
  0x59   : > { %s4057_s20 = sadd.s32 4294967295, %s3833_s11   ;;  %s2736_s15 = sadd.s32 4294967294, %s3833_s11  }
  0x5a   : > { %p56_p1 = scmp.ne.s32.totalorder %s3809_s28, %s3805_s27  ;;  %p5184_p4 = scmp.eq.s32.totalorder %s4057_s20, 0 }
  0x5b   : > { %s207_s17 = sadd.s32 1, %s3801_s26  ;;  %p217_p5 = scmp.ne.s32.totalorder %s3801_s26, %s3797_s25 }
  0x5c   : > { %p4068_p6 = por %p5184_p4, %p56_p1  ;;  %p218_p9 = scmp.eq.s32.totalorder %s4057_s20, 3 }
  0x5d   : > { %p5208_p11 = scmp.eq.s32.totalorder %s3966_s21, 0  ;;  %p223_p0 = scmp.ne.s32.totalorder %s3797_s25, %s3793_s24 }
  0x5e   : > { %s5207_s19 = scalar_select %p4068_p6, 1, 0 }
  0x5f   : > { %s4076_s0 = scalar_select %p5208_p11, %s3801_s26, %s207_s17  }
  0x60   : > { %p4078_p13 = por %p218_p9, %p217_p5  ;;  %p224_p7 = scmp.eq.s32.totalorder %s2736_s15, 3 }
  0x61   : > { %5209 = sst [smem:[#allocation22_spill]] %s4076_s0  ;;  %p2737_p12 = scmp.ge.s32.totalorder %s3833_s11, 1 }
  0x62   : > { %s5210_s23 = scalar_select %p4078_p13, 1, 0 }
  0x63   : > { %p231_p2 = scmp.lt.s32.totalorder %s3833_s11, 5  ;;  %p4086_p3 = por %p224_p7, %p223_p0 }
  0x64   : > { %s3841_s21 = smov [#allocation6]   ;;  %s312_s17 = scalar_lea.vmem [#allocation9], %s3988_s14 }
  0x65   : > { %s5211_s27 = scalar_select %p4086_p3, 1, 0 }
  0x66   : > { %p4090_p1 = pnand %p2737_p12, %p231_p2  ;;  %s249_s9 = sshll.u32 %s3841_s21, 4  ;;  %s4094_s9 = int_to_ptr.vmem [resolvable:$true] %s249_s9 }
  0x67   : > { %5212 = sst [smem:[#allocation23_spill]] %s5211_s27  ;;  %s319_s13 = sshll.u32 %s312_s17, 4  ;;  %s4112_s13 = int_to_ptr.vmem [resolvable:$true] %s319_s13 }
  0x68   : > { %s5213_s4 = scalar_select %p4090_p1, 1, 0 }
  0x69   : > { %p3161_p5 = pneg %p4090_p1  ;;  %s4110_s22 = scalar_lea.hbm %s5173_s6, %s2878_s18 }
  0x6a   : > { %s3645_s0 = scalar_lea.hbm %s5170_s3, 12288 }
  0x6b   : > { %p4100_p9 = pnand %p3161_p5, %p5184_p4  ;;  %p3646_p11 = scmp.ne.s32.totalorder %s5170_s3, %s3645_s0 }
  0x6c   : > { %p3652_p2 = scmp.lt.u32.totalorder %s3645_s0, %s5170_s3 }
  0x6d   : > { %p3647_p0 = pneg %p4100_p9 }
  0x6f   : > { %p3648_p7 = pnand %p3647_p0, %p3646_p11 }
  0x71   : > { %p3649_p12 = pneg %p3648_p7 }
  0x73   : > { %p3654_p5 = pnand %p3652_p2, %p3649_p12 }
  0x75   : > { %3657 = shalt.err (!%p3654_p5)
}
  0x76   : > { %s3658_s5 = scalar_lea.vmem %s4094_s9, 12288  ;;  %p3666_p6 = scmp.lt.s32.totalorder %s4094_s9, %s4094_s9 }
  0x77   : > { %p3659_p4 = scmp.ne.s32.totalorder %s4094_s9, %s3658_s5  ;;  %p3667_p1 = scmp.lt.s32.totalorder %s3658_s5, %s3658_s5 }
  0x79   : > { %p3661_p3 = pnand %p3659_p4, %p3647_p0  ;;  %p3668_p8 = por %p3667_p1, %p3666_p6 }
  0x7b   : > { %p3662_p13 = pneg %p3661_p3 }
  0x7d   : > { %p3669_p10 = pnand %p3668_p8, %p3662_p13 }
  0x7f   : > { %3672 = shalt.err (!%p3669_p10)
}
  0x80   : > { %s3842_s26 = smov 384   ;;  %s3843_s29 = smov 24  }
  0x81   : > { %3164 = dma.hbm_to_vmem [thread:$0]  (!%p4100_p9), %s5170_s3, 12288, %s4094_s9, [#allocation7], %s3842_s26, %s3842_s26, %s3843_s29  }
  0x82   : > { %s3673_s0 = scalar_lea.hbm %s4110_s22, 1024  ;;  %p5215_p3 = scmp.ne.s32.totalorder %s5205_s8, 0 }
  0x83   : > { %p3674_p4 = scmp.ne.s32.totalorder %s4110_s22, %s3673_s0  ;;  %s3678_s14 = scalar_lea.hbm %s5173_s6, 2048 }
  0x84   : > { %p3679_p10 = scmp.lt.u32.totalorder %s4110_s22, %s5173_s6  ;;  %p3680_p13 = scmp.lt.u32.totalorder %s3678_s14, %s3673_s0 }
  0x85   : > { %p3676_p6 = pnand %p3674_p4, %p5215_p3  ;;  %p3682_p11 = scmp.lt.u32.totalorder %s3673_s0, %s4110_s22 }
  0x86   : > { %p3681_p1 = por %p3680_p13, %p3679_p10 }
  0x87   : > { %p3677_p8 = pneg %p3676_p6 }
  0x88   : > { %p3683_p0 = por %p3682_p11, %p3681_p1 }
  0x8a   : > { %p3684_p7 = pnand %p3683_p0, %p3677_p8 }
  0x8c   : > { %3687 = shalt.err (!%p3684_p7)
}
  0x8d   : > { %s3688_s9 = scalar_lea.vmem %s4112_s13, 1024  ;;  %s3844_s15 = smov [#allocation9]  }
  0x8e   : > { %p3689_p9 = scmp.ne.s32.totalorder %s4112_s13, %s3688_s9  ;;  %s3693_s26 = sshll.u32 %s3844_s15, 4  ;;  %s3694_s26 = int_to_ptr.vmem [resolvable:$false] %s3693_s26 }
  0x8f   : > { %s3695_s29 = scalar_lea.vmem %s3694_s26, 2048  ;;  %p3696_p5 = scmp.lt.s32.totalorder %s4112_s13, %s3694_s26 }
  0x90   : > { %p3691_p12 = pnand %p3689_p9, %p5215_p3  ;;  %p3697_p4 = scmp.lt.s32.totalorder %s3695_s29, %s3688_s9 }
  0x92   : > { %p3692_p2 = pneg %p3691_p12  ;;  %p3698_p6 = por %p3697_p4, %p3696_p5 }
  0x94   : > { %p3699_p10 = pnand %p3698_p6, %p3692_p2 }
  0x96   : > { %3702 = shalt.err (!%p3699_p10)
}
  0x97   : > { %p5216_p8 = scmp.ne.s32.totalorder %s5204_s16, 0  ;;  %s5217_s18 = smov 4  }
  0x98   : > { %s5218_s7 = smov 64   ;;  %p5219_p3 = scmp.ne.s32.totalorder %s5213_s4, 0 }
  0x99   : > { %3174 = dma.hbm_to_vmem [thread:$0]  (!%p5216_p8), %s4110_s22, 1024, %s4112_s13, %s3990_s12, %s5218_s7, %s5218_s7, %s5217_s18  }
  0x9a   : > { %331 = sbr.rel (%p5219_p3) target bundleno = 1984 (0x7c0), region = 48  ;;  %s333_s8 = sand.u32 (!%p5219_p3), 1, %s4057_s20  }
  0x9b   : > { %s335_s0 = sand.u32 (!%p5219_p3), 1, %s3809_s28   ;;  %s334_s21 = scalar_lea.sflag (!%p5219_p3), [#allocation4], %s333_s8 }
  0x9c   : > { %s2750_s27 = sshll.u32 (!%p5219_p3), %s335_s0, 8  ;;  %p5220_p13 = scmp.ne.s32.totalorder (!%p5219_p3), %s5207_s19, 0 }
  0x9d   : > { %s4164_s14 = scalar_lea.vmem (!%p5219_p3), [#allocation3], %s2750_s27 }
  0xa1   : > { %3776 = dma.done.wait (%p5220_p13), %s334_s21, 4096  }
  0xa2   : > { %3778 = vsyncadd (%p5220_p13), %s334_s21, 4294963200  ;;  %p5221_p1 = scmp.eq.s32.totalorder %s4057_s20, 0 }
  0xa4   : > { %3780 = dma.done.wait (%p5221_p1), [#allocation7], 12288   ;;  %p5222_p11 = pmov %p5221_p1 }
  0xa5   : > { %s2752_s22 = sshll.u32 %s335_s0, 6 }
  0xa6   : > { %3782 = vsyncadd (%p5222_p11), [#allocation7], 4294955008  ;;  %s4174_s16 = scalar_lea.vmem [#allocation8], %s2752_s22 }
  0xa7   : > { %3784 = dma.done.wait (%p5220_p13), %s334_s21, 2048  }
  0xa8   : > { %3786 = vsyncadd (%p5220_p13), %s334_s21, 4294965248  ;;  %s397_s12 = sand.u32 1, %s3797_s25   ;;  %s4183_s4 = scalar_lea.vmem [#allocation9], %s2752_s22 }
  0xa9   : > { %s2754_s13 = sshll.u32 %s397_s12, 6  ;;  %p2755_p0 = scmp.ne.s32.totalorder %s3817_s30, 0 }
  0xaa   : > { %s4185_s17 = scalar_lea.vmem [#allocation10], %s2754_s13  ;;  %v4189_v0 = vld [vmem:[%s4164_s14] sm:$0xff] (!%p2755_p0)  ;;  %v4192_v1 = vld [vmem:[%s4164_s14 + $0x8] sm:$0xff] (!%p2755_p0)  ;;  %v4203_v5 = vld [vmem:[%s4164_s14 + $0x10] sm:$0xff] (!%p2755_p0)  ;;  %s5223_s29 = sld [smem:[#allocation25_spill]] (!%p2755_p0) }
  0xab   : > { %404 = sbr.rel (%p2755_p0) target bundleno = 801 (0x321), region = 68  ;;  %v4195_v2 = vld [vmem:[%s4164_s14 + $0x20] sm:$0xff] (!%p2755_p0)  ;;  %v439_v3 = vadd.f32 (!%p2755_p0), %v4192_v1, %v4189_v0  ;;  %v4200_v4 = vld [vmem:[%s4164_s14 + $0x28] sm:$0xff] (!%p2755_p0)  ;;  %v4206_v6 = vld [vmem:[%s4164_s14 + $0x18] sm:$0xff] (!%p2755_p0) }
  0xac   : > { %v445_v7 = vadd.f32 (!%p2755_p0), %v4200_v4, %v4195_v2  ;;  %v4211_v8 = vld [vmem:[%s4164_s14 + $0x30] sm:$0xff] (!%p2755_p0)  ;;  %v4214_v9 = vld [vmem:[%s4164_s14 + $0x38] sm:$0xff] (!%p2755_p0)  ;;  %v442_v10 = vadd.f32 (!%p2755_p0), %v4206_v6, %v4203_v5  ;;  %v4221_v12 = vld [vmem:[%s4164_s14 + $0x40] sm:$0xff] (!%p2755_p0) }
  0xad   : > { %440 = vadd.xlane.f32.xlu0 (!%p2755_p0), %v439_v3  ;;  %v448_v11 = vadd.f32 (!%p2755_p0), %v4214_v9, %v4211_v8  ;;  %v4224_v13 = vld [vmem:[%s4164_s14 + $0x48] sm:$0xff] (!%p2755_p0)  ;;  %v4227_v14 = vld [vmem:[%s4164_s14 + $0x50] sm:$0xff] (!%p2755_p0)  ;;  %v4230_v15 = vld [vmem:[%s4164_s14 + $0x58] sm:$0xff] (!%p2755_p0) }
  0xae   : > { %446 = vadd.xlane.f32.xlu1 (!%p2755_p0), %v445_v7  ;;  %v451_v16 = vadd.f32 (!%p2755_p0), %v4224_v13, %v4221_v12  ;;  %v454_v17 = vadd.f32 (!%p2755_p0), %v4230_v15, %v4227_v14  ;;  %v4237_v18 = vld [vmem:[%s4164_s14 + $0x60] sm:$0xff] (!%p2755_p0)  ;;  %v4240_v19 = vld [vmem:[%s4164_s14 + $0x68] sm:$0xff] (!%p2755_p0)  ;;  %v4243_v20 = vld [vmem:[%s4164_s14 + $0x70] sm:$0xff] (!%p2755_p0) }
  0xaf   : > { %v4246_v21 = vld [vmem:[%s4164_s14 + $0x78] sm:$0xff] (!%p2755_p0)  ;;  %v4249_v22 = vld [vmem:[%s4164_s14 + $0x80] sm:$0xff] (!%p2755_p0)  ;;  %v4252_v23 = vld [vmem:[%s4164_s14 + $0x88] sm:$0xff] (!%p2755_p0)  ;;  %v457_v24 = vadd.f32 (!%p2755_p0), %v4240_v19, %v4237_v18 }
  0xb0   : > { %v4257_v25 = vld [vmem:[%s4164_s14 + $0x90] sm:$0xff] (!%p2755_p0)  ;;  %v4260_v26 = vld [vmem:[%s4164_s14 + $0x98] sm:$0xff] (!%p2755_p0)  ;;  %v460_v27 = vadd.f32 (!%p2755_p0), %v4246_v21, %v4243_v20  ;;  %v4265_v28 = vld [vmem:[%s4164_s14 + $0xa0] sm:$0xff] (!%p2755_p0)  ;;  %v463_v30 = vadd.f32 (!%p2755_p0), %v4252_v23, %v4249_v22 }
  0xb1   : > { %443 = vadd.xlane.f32.xlu0 (!%p2755_p0), %v442_v10  ;;  %v4268_v29 = vld [vmem:[%s4164_s14 + $0xa8] sm:$0xff] (!%p2755_p0)  ;;  %v4273_v31 = vld [vmem:[%s4164_s14 + $0xb0] sm:$0xff] (!%p2755_p0)  ;;  %v4276_v32 = vld [vmem:[%s4164_s14 + $0xb8] sm:$0xff] (!%p2755_p0)  ;;  %v466_v33 = vadd.f32 (!%p2755_p0), %v4260_v26, %v4257_v25 }
  0xb2   : > { %449 = vadd.xlane.f32.xlu1 %v448_v11  ;;  %v4281_v34 = vld [vmem:[%s4164_s14 + $0xc0] sm:$0xff]  ;;  %v4284_v35 = vld [vmem:[%s4164_s14 + $0xc8] sm:$0xff]  ;;  %v469_v36 = vadd.f32 %v4268_v29, %v4265_v28  ;;  %v4289_v37 = vld [vmem:[%s4164_s14 + $0xd0] sm:$0xff]  ;;  %v472_v39 = vadd.f32 %v4276_v32, %v4273_v31 }
  0xb3   : > { %v4292_v38 = vld [vmem:[%s4164_s14 + $0xd8] sm:$0xff]  ;;  %v4297_v40 = vld [vmem:[%s4164_s14 + $0xe0] sm:$0xff]  ;;  %v4300_v41 = vld [vmem:[%s4164_s14 + $0xe8] sm:$0xff]  ;;  %v475_v42 = vadd.f32 %v4284_v35, %v4281_v34 }
  0xb4   : > { %v4305_v43 = vld [vmem:[%s4164_s14 + $0xf0] sm:$0xff]  ;;  %v4308_v44 = vld [vmem:[%s4164_s14 + $0xf8] sm:$0xff]  ;;  %v478_v45 = vadd.f32 %v4292_v38, %v4289_v37  ;;  %v481_v46 = vadd.f32 %v4300_v41, %v4297_v40  ;;  %v3283_v49 = vld [vmem:[#allocation6 + $0xc] ss:$24 sps:$4 sm:$0xff]  }
  0xb5   : > { %452 = vadd.xlane.f32.xlu0 %v451_v16  ;;  %v484_v47 = vadd.f32 %v4308_v44, %v4305_v43  ;;  %v3281_v48 = vld [vmem:[#allocation6 + $0x4] ss:$24 sps:$4 sm:$0xff]   ;;  %v3285_v50 = vld [vmem:[#allocation6] ss:$24 sps:$4 sm:$0xff]   ;;  %v3287_v52 = vld [vmem:[#allocation6 + $0x34] ss:$24 sps:$4 sm:$0xff]   ;;  %1519 = vmatprep.subr.bf16.mxu1 %v3283_v49 }
  0xb6   : > { %455 = vadd.xlane.f32.xlu1 %v454_v17  ;;  %v3286_v51 = vld [vmem:[#allocation6 + $0x8] ss:$24 sps:$4 sm:$0xff]   ;;  %v3289_v53 = vld [vmem:[#allocation6 + $0x3c] ss:$24 sps:$4 sm:$0xff]   ;;  %1406 = vmatprep.subr.bf16.mxu0 %v3281_v48  ;;  %v3292_v55 = vld [vmem:[#allocation6 + $0x38] ss:$24 sps:$4 sm:$0xff]  }
  0xb7   : > { %1407 = vmatpush1.bf16.msra.mxu0 %v3285_v50  ;;  %1520 = vmatpush1.bf16.msra.mxu1 %v3286_v51  ;;  %v3291_v54 = vld [vmem:[#allocation6 + $0x30] ss:$24 sps:$4 sm:$0xff]   ;;  %v3293_v56 = vld [vmem:[#allocation6 + $0x64] ss:$24 sps:$4 sm:$0xff]   ;;  %v3297_v58 = vld [vmem:[#allocation6 + $0x60] ss:$24 sps:$4 sm:$0xff]  }
  0xb8   : > { %1408 = vmatprep.subr.bf16.mxu0 %v3287_v52  ;;  %1521 = vmatprep.subr.bf16.mxu1 %v3289_v53  ;;  %v3295_v57 = vld [vmem:[#allocation6 + $0x6c] ss:$24 sps:$4 sm:$0xff]   ;;  %v3298_v59 = vld [vmem:[#allocation6 + $0x68] ss:$24 sps:$4 sm:$0xff]   ;;  %v3301_v61 = vld [vmem:[#allocation6 + $0x9c] ss:$24 sps:$4 sm:$0xff]  }
  0xb9   : > { %458 = vadd.xlane.f32.xlu0 %v457_v24  ;;  %v3299_v60 = vld [vmem:[#allocation6 + $0x94] ss:$24 sps:$4 sm:$0xff]   ;;  %v3303_v62 = vld [vmem:[#allocation6 + $0x90] ss:$24 sps:$4 sm:$0xff]   ;;  %v3305_v3 = vld [vmem:[#allocation6 + $0xc4] ss:$24 sps:$4 sm:$0xff]  }
  0xba   : > { %461 = vadd.xlane.f32.xlu1 %v460_v27  ;;  %v3304_v63 = vld [vmem:[#allocation6 + $0x98] ss:$24 sps:$4 sm:$0xff]   ;;  %v3307_v7 = vld [vmem:[#allocation6 + $0xcc] ss:$24 sps:$4 sm:$0xff]   ;;  %v3310_v11 = vld [vmem:[#allocation6 + $0xc8] ss:$24 sps:$4 sm:$0xff]  }
  0xbb   : > { %1409 = vmatpush1.bf16.msra.mxu0 %v3291_v54  ;;  %1522 = vmatpush1.bf16.msra.mxu1 %v3292_v55  ;;  %v3309_v10 = vld [vmem:[#allocation6 + $0xc0] ss:$24 sps:$4 sm:$0xff]   ;;  %v3311_v16 = vld [vmem:[#allocation6 + $0xf4] ss:$24 sps:$4 sm:$0xff]   ;;  %v3315_v24 = vld [vmem:[#allocation6 + $0xf0] ss:$24 sps:$4 sm:$0xff]  }
  0xbc   : > { %1410 = vmatprep.subr.bf16.mxu0 %v3293_v56  ;;  %1523 = vmatprep.subr.bf16.mxu1 %v3295_v57  ;;  %v3313_v17 = vld [vmem:[#allocation6 + $0xfc] ss:$24 sps:$4 sm:$0xff]   ;;  %v3316_v27 = vld [vmem:[#allocation6 + $0xf8] ss:$24 sps:$4 sm:$0xff]   ;;  %v3331_v49 = vld [vmem:[#allocation6 + $0x18c] ss:$24 sps:$4 sm:$0xff]  }
  0xbd   : > { %464 = vadd.xlane.f32.xlu0 %v463_v30  ;;  %v3317_v30 = vld [vmem:[#allocation6 + $0x124] ss:$24 sps:$4 sm:$0xff]   ;;  %v3333_v50 = vld [vmem:[#allocation6 + $0x180] ss:$24 sps:$4 sm:$0xff]   ;;  %v3335_v52 = vld [vmem:[#allocation6 + $0x1b4] ss:$24 sps:$4 sm:$0xff]  }
  0xbe   : > { %467 = vadd.xlane.f32.xlu1 %v466_v33  ;;  %v3319_v33 = vld [vmem:[#allocation6 + $0x12c] ss:$24 sps:$4 sm:$0xff]   ;;  %v3334_v51 = vld [vmem:[#allocation6 + $0x188] ss:$24 sps:$4 sm:$0xff]   ;;  %v3337_v53 = vld [vmem:[#allocation6 + $0x1bc] ss:$24 sps:$4 sm:$0xff]  }
  0xbf   : > { %1411 = vmatpush1.bf16.msra.mxu0 %v3297_v58  ;;  %1524 = vmatpush1.bf16.msra.mxu1 %v3298_v59  ;;  %v3329_v48 = vld [vmem:[#allocation6 + $0x184] ss:$24 sps:$4 sm:$0xff]  }
  0xc0   : > { %1412 = vmatprep.subr.bf16.mxu0 %v3299_v60  ;;  %1525 = vmatprep.subr.bf16.mxu1 %v3301_v61 }
  0xc1   : > { %470 = vadd.xlane.f32.xlu0 %v469_v36  ;;  %v3321_v36 = vld [vmem:[#allocation6 + $0x120] ss:$24 sps:$4 sm:$0xff]  }
  0xc2   : > { %473 = vadd.xlane.f32.xlu1 %v472_v39  ;;  %v3322_v39 = vld [vmem:[#allocation6 + $0x128] ss:$24 sps:$4 sm:$0xff]  }
  0xc3   : > { %1413 = vmatpush1.bf16.msra.mxu0 %v3303_v62  ;;  %1526 = vmatpush1.bf16.msra.mxu1 %v3304_v63 }
  0xc4   : > { %1414 = vmatprep.subr.bf16.mxu0 %v3305_v3  ;;  %1527 = vmatprep.subr.bf16.mxu1 %v3307_v7 }
  0xc5   : > { %476 = vadd.xlane.f32.xlu0 %v475_v42  ;;  %v3323_v42 = vld [vmem:[#allocation6 + $0x154] ss:$24 sps:$4 sm:$0xff]  }
  0xc6   : > { %479 = vadd.xlane.f32.xlu1 %v478_v45  ;;  %v3325_v45 = vld [vmem:[#allocation6 + $0x15c] ss:$24 sps:$4 sm:$0xff]  }
  0xc7   : > { %1415 = vmatpush1.bf16.msra.mxu0 %v3309_v10  ;;  %1528 = vmatpush1.bf16.msra.mxu1 %v3310_v11 }
  0xc8   : > { %1416 = vmatprep.subr.bf16.mxu0 %v3311_v16  ;;  %1529 = vmatprep.subr.bf16.mxu1 %v3313_v17 }
  0xc9   : > { %482 = vadd.xlane.f32.xlu0 %v481_v46  ;;  %v3327_v46 = vld [vmem:[#allocation6 + $0x150] ss:$24 sps:$4 sm:$0xff]  }
  0xca   : > { %485 = vadd.xlane.f32.xlu1 %v484_v47  ;;  %v3328_v47 = vld [vmem:[#allocation6 + $0x158] ss:$24 sps:$4 sm:$0xff]  }
  0xcb   : > { %1417 = vmatpush1.bf16.msra.mxu0 %v3315_v24  ;;  %1530 = vmatpush1.bf16.msra.mxu1 %v3316_v27 }
  0xcc   : > { %1418 = vmatprep.subr.bf16.mxu0 %v3317_v30  ;;  %1531 = vmatprep.subr.bf16.mxu1 %v3319_v33 }
  0xcf   : > { %1419 = vmatpush1.bf16.msra.mxu0 %v3321_v36  ;;  %1532 = vmatpush1.bf16.msra.mxu1 %v3322_v39 }
  0xd0   : > { %1420 = vmatprep.subr.bf16.mxu0 %v3323_v42  ;;  %1533 = vmatprep.subr.bf16.mxu1 %v3325_v45 }
  0xd3   : > { %1421 = vmatpush1.bf16.msra.mxu0 %v3327_v46  ;;  %1534 = vmatpush1.bf16.msra.mxu1 %v3328_v47 }
  0xd4   : > { %1422 = vmatprep.subr.bf16.mxu0 %v3329_v48  ;;  %1535 = vmatprep.subr.bf16.mxu1 %v3331_v49 }
  0xd7   : > { %1423 = vmatpush1.bf16.msra.mxu0 %v3333_v50  ;;  %1536 = vmatpush1.bf16.msra.mxu1 %v3334_v51 }
  0xd8   : > { %1424 = vmatprep.subr.bf16.mxu0 %v3335_v52  ;;  %1537 = vmatprep.subr.bf16.mxu1 %v3337_v53 }
 0x13a   : > { %v441_v54 = vpop.xlane.xlu0 %440 }
 0x13b   : > { %v488_v55 = vmul.f32 0.00390625, %v441_v54  ;;  %v447_v56 = vpop.xlane.xlu1 %446 }
 0x13c   : > { %v490_v57 = vmul.f32 0.00390625, %v447_v56 }
 0x13d   : > { %v4317_v58 = vsub.f32 %v4189_v0, %v488_v55  ;;  %v4320_v59 = vsub.f32 %v4192_v1, %v488_v55 }
 0x13e   : > { %v4323_v60 = vsub.f32 %v4195_v2, %v490_v57  ;;  %v4326_v61 = vsub.f32 %v4200_v4, %v490_v57  ;;  %v444_v62 = vpop.xlane.xlu0 %443 }
 0x13f   : > { %v489_v63 = vmul.f32 0.00390625, %v444_v62  ;;  %v450_v3 = vpop.xlane.xlu1 %449  ;;  %v536_v7 = vmul.f32 %v4317_v58, %v4317_v58  ;;  %v537_v10 = vmul.f32 %v4320_v59, %v4320_v59 }
 0x140   : > { %v491_v0 = vmul.f32 0.00390625, %v450_v3  ;;  %v540_v1 = vmul.f32 %v4323_v60, %v4323_v60  ;;  %v541_v2 = vmul.f32 %v4326_v61, %v4326_v61 }
 0x141   : > { %v4337_v11 = vsub.f32 %v4203_v5, %v489_v63  ;;  %v4340_v4 = vsub.f32 %v4206_v6, %v489_v63  ;;  %v568_v16 = vadd.f32 %v537_v10, %v536_v7 }
 0x142   : > { %v4343_v17 = vsub.f32 %v4211_v8, %v491_v0  ;;  %v4346_v24 = vsub.f32 %v4214_v9, %v491_v0  ;;  %v453_v27 = vpop.xlane.xlu0 %452  ;;  %v574_v36 = vadd.f32 %v541_v2, %v540_v1 }
 0x143   : > { %v492_v30 = vmul.f32 0.00390625, %v453_v27  ;;  %569 = vadd.xlane.f32.xlu0 %v568_v16  ;;  %v456_v33 = vpop.xlane.xlu1 %455  ;;  %v538_v39 = vmul.f32 %v4337_v11, %v4337_v11  ;;  %v539_v5 = vmul.f32 %v4340_v4, %v4340_v4 }
 0x144   : > { %v493_v6 = vmul.f32 0.00390625, %v456_v33  ;;  %v542_v42 = vmul.f32 %v4343_v17, %v4343_v17  ;;  %v543_v8 = vmul.f32 %v4346_v24, %v4346_v24 }
 0x145   : > { %v4357_v9 = vsub.f32 %v4221_v12, %v492_v30  ;;  %v4360_v45 = vsub.f32 %v4224_v13, %v492_v30  ;;  %v571_v46 = vadd.f32 %v539_v5, %v538_v39 }
 0x146   : > { %v4363_v47 = vsub.f32 %v4227_v14, %v493_v6  ;;  %v4366_v48 = vsub.f32 %v4230_v15, %v493_v6  ;;  %v459_v49 = vpop.xlane.xlu0 %458  ;;  %v577_v52 = vadd.f32 %v543_v8, %v542_v42  ;;  %v3339_v42 = vld [vmem:[#allocation6 + $0x1b0] ss:$24 sps:$4 sm:$0xff]  }
 0x147   : > { %v494_v50 = vmul.f32 0.00390625, %v459_v49  ;;  %575 = vadd.xlane.f32.xlu0 %v574_v36  ;;  %572 = vadd.xlane.f32.xlu1 %v571_v46  ;;  %v462_v51 = vpop.xlane.xlu1 %461  ;;  %v544_v12 = vmul.f32 %v4357_v9, %v4357_v9  ;;  %v545_v13 = vmul.f32 %v4360_v45, %v4360_v45  ;;  %v3340_v8 = vld [vmem:[#allocation6 + $0x1b8] ss:$24 sps:$4 sm:$0xff]  }
 0x148   : > { %v495_v53 = vmul.f32 0.00390625, %v462_v51  ;;  %v546_v14 = vmul.f32 %v4363_v47, %v4363_v47  ;;  %v547_v15 = vmul.f32 %v4366_v48, %v4366_v48  ;;  %1425 = vmatpush1.bf16.msra.mxu0 %v3339_v42  ;;  %1538 = vmatpush1.bf16.msra.mxu1 %v3340_v8  ;;  %v3352_v42 = vld [vmem:[#allocation6 + $0x218] ss:$24 sps:$4 sm:$0xff]  }
 0x149   : > { %v4377_v54 = vsub.f32 %v4237_v18, %v494_v50  ;;  %v4380_v55 = vsub.f32 %v4240_v19, %v494_v50  ;;  %v580_v56 = vadd.f32 %v545_v13, %v544_v12 }
 0x14a   : > { %v4383_v57 = vsub.f32 %v4243_v20, %v495_v53  ;;  %v4386_v62 = vsub.f32 %v4246_v21, %v495_v53  ;;  %v465_v63 = vpop.xlane.xlu0 %464  ;;  %v583_v10 = vadd.f32 %v547_v15, %v546_v14  ;;  %v3341_v15 = vld [vmem:[#allocation6 + $0x1e4] ss:$24 sps:$4 sm:$0xff]  }
 0x14b   : > { %v496_v3 = vmul.f32 0.00390625, %v465_v63  ;;  %578 = vadd.xlane.f32.xlu1 %v577_v52  ;;  %581 = vadd.xlane.f32.xlu0 %v580_v56  ;;  %v468_v7 = vpop.xlane.xlu1 %467  ;;  %v548_v18 = vmul.f32 %v4377_v54, %v4377_v54  ;;  %v549_v19 = vmul.f32 %v4380_v55, %v4380_v55 }
 0x14c   : > { %v497_v0 = vmul.f32 0.00390625, %v468_v7  ;;  %v550_v20 = vmul.f32 %v4383_v57, %v4383_v57  ;;  %v551_v21 = vmul.f32 %v4386_v62, %v4386_v62  ;;  %1426 = vmatprep.subr.bf16.mxu0 %v3341_v15 }
 0x14d   : > { %v4397_v1 = vsub.f32 %v4249_v22, %v496_v3  ;;  %v4400_v2 = vsub.f32 %v4252_v23, %v496_v3  ;;  %v586_v16 = vadd.f32 %v549_v19, %v548_v18  ;;  %v3345_v18 = vld [vmem:[#allocation6 + $0x1e0] ss:$24 sps:$4 sm:$0xff]  }
 0x14e   : > { %v4403_v27 = vsub.f32 %v4257_v25, %v497_v0  ;;  %v4406_v30 = vsub.f32 %v4260_v26, %v497_v0  ;;  %v471_v33 = vpop.xlane.xlu0 %470  ;;  %v589_v5 = vadd.f32 %v551_v21, %v550_v20  ;;  %v3346_v19 = vld [vmem:[#allocation6 + $0x1e8] ss:$24 sps:$4 sm:$0xff]   ;;  %1427 = vmatpush1.bf16.msra.mxu0 %v3345_v18  ;;  %v3367_v18 = vld [vmem:[#allocation6 + $0x2ac] ss:$24 sps:$4 sm:$0xff]  }
 0x14f   : > { %v498_v36 = vmul.f32 0.00390625, %v471_v33  ;;  %584 = vadd.xlane.f32.xlu1 %v583_v10  ;;  %587 = vadd.xlane.f32.xlu0 %v586_v16  ;;  %v474_v39 = vpop.xlane.xlu1 %473  ;;  %v552_v22 = vmul.f32 %v4397_v1, %v4397_v1  ;;  %v553_v23 = vmul.f32 %v4400_v2, %v4400_v2 }
 0x150   : > { %v499_v6 = vmul.f32 0.00390625, %v474_v39  ;;  %v554_v25 = vmul.f32 %v4403_v27, %v4403_v27  ;;  %v555_v26 = vmul.f32 %v4406_v30, %v4406_v30 }
 0x151   : > { %v4417_v46 = vsub.f32 %v4265_v28, %v498_v36  ;;  %v4420_v49 = vsub.f32 %v4268_v29, %v498_v36  ;;  %v592_v50 = vadd.f32 %v553_v23, %v552_v22  ;;  %v3349_v22 = vld [vmem:[#allocation6 + $0x21c] ss:$24 sps:$4 sm:$0xff]  }
 0x152   : > { %v4423_v51 = vsub.f32 %v4273_v31, %v499_v6  ;;  %v4426_v52 = vsub.f32 %v4276_v32, %v499_v6  ;;  %v477_v12 = vpop.xlane.xlu0 %476  ;;  %v595_v14 = vadd.f32 %v555_v26, %v554_v25  ;;  %v3343_v31 = vld [vmem:[#allocation6 + $0x1ec] ss:$24 sps:$4 sm:$0xff]   ;;  %v3351_v26 = vld [vmem:[#allocation6 + $0x210] ss:$24 sps:$4 sm:$0xff]  }
 0x153   : > { %v500_v13 = vmul.f32 0.00390625, %v477_v12  ;;  %590 = vadd.xlane.f32.xlu1 %v589_v5  ;;  %593 = vadd.xlane.f32.xlu0 %v592_v50  ;;  %v480_v53 = vpop.xlane.xlu1 %479  ;;  %v556_v28 = vmul.f32 %v4417_v46, %v4417_v46  ;;  %v557_v29 = vmul.f32 %v4420_v49, %v4420_v49  ;;  %v3347_v5 = vld [vmem:[#allocation6 + $0x214] ss:$24 sps:$4 sm:$0xff]  }
 0x154   : > { %v501_v56 = vmul.f32 0.00390625, %v480_v53  ;;  %v558_v32 = vmul.f32 %v4423_v51, %v4423_v51  ;;  %v559_v63 = vmul.f32 %v4426_v52, %v4426_v52  ;;  %1539 = vmatprep.subr.bf16.mxu1 %v3343_v31  ;;  %1428 = vmatprep.subr.bf16.mxu0 %v3347_v5  ;;  %v3355_v53 = vld [vmem:[#allocation6 + $0x24c] ss:$24 sps:$4 sm:$0xff]  }
 0x155   : > { %v4437_v3 = vsub.f32 %v4281_v34, %v500_v13  ;;  %v4440_v7 = vsub.f32 %v4284_v35, %v500_v13  ;;  %v598_v10 = vadd.f32 %v557_v29, %v556_v28  ;;  %1540 = vmatpush1.bf16.msra.mxu1 %v3346_v19  ;;  %1429 = vmatpush1.bf16.msra.mxu0 %v3351_v26  ;;  %v3357_v28 = vld [vmem:[#allocation6 + $0x240] ss:$24 sps:$4 sm:$0xff]   ;;  %v3359_v31 = vld [vmem:[#allocation6 + $0x274] ss:$24 sps:$4 sm:$0xff]  }
 0x156   : > { %v4443_v0 = vsub.f32 %v4289_v37, %v501_v56  ;;  %v4446_v20 = vsub.f32 %v4292_v38, %v501_v56  ;;  %v483_v21 = vpop.xlane.xlu0 %482  ;;  %v601_v33 = vadd.f32 %v559_v63, %v558_v32  ;;  %1541 = vmatprep.subr.bf16.mxu1 %v3349_v22  ;;  %v3358_v29 = vld [vmem:[#allocation6 + $0x248] ss:$24 sps:$4 sm:$0xff]   ;;  %v3361_v56 = vld [vmem:[#allocation6 + $0x27c] ss:$24 sps:$4 sm:$0xff]   ;;  %v3364_v63 = vld [vmem:[#allocation6 + $0x278] ss:$24 sps:$4 sm:$0xff]  }
 0x157   : > { %v502_v16 = vmul.f32 0.00390625, %v483_v21  ;;  %596 = vadd.xlane.f32.xlu1 %v595_v14  ;;  %599 = vadd.xlane.f32.xlu0 %v598_v10  ;;  %v486_v34 = vpop.xlane.xlu1 %485  ;;  %v560_v35 = vmul.f32 %v4437_v3, %v4437_v3  ;;  %v561_v36 = vmul.f32 %v4440_v7, %v4440_v7  ;;  %v3363_v32 = vld [vmem:[#allocation6 + $0x270] ss:$24 sps:$4 sm:$0xff]   ;;  %v3365_v10 = vld [vmem:[#allocation6 + $0x2a4] ss:$24 sps:$4 sm:$0xff]  }
 0x158   : > { %v503_v39 = vmul.f32 0.00390625, %v486_v34  ;;  %v562_v37 = vmul.f32 %v4443_v0, %v4443_v0  ;;  %v563_v38 = vmul.f32 %v4446_v20, %v4446_v20  ;;  %v3369_v19 = vld [vmem:[#allocation6 + $0x2a0] ss:$24 sps:$4 sm:$0xff]   ;;  %v3373_v34 = vld [vmem:[#allocation6 + $0x2dc] ss:$24 sps:$4 sm:$0xff]  }
 0x159   : > { %v4457_v23 = vsub.f32 %v4297_v40, %v502_v16  ;;  %v4460_v6 = vsub.f32 %v4300_v41, %v502_v16  ;;  %v604_v25 = vadd.f32 %v561_v36, %v560_v35  ;;  %1542 = vmatpush1.bf16.msra.mxu1 %v3352_v42  ;;  %v3370_v21 = vld [vmem:[#allocation6 + $0x2a8] ss:$24 sps:$4 sm:$0xff]   ;;  %v3371_v16 = vld [vmem:[#allocation6 + $0x2d4] ss:$24 sps:$4 sm:$0xff]   ;;  %v3376_v35 = vld [vmem:[#allocation6 + $0x2d8] ss:$24 sps:$4 sm:$0xff]  }
 0x15a   : > { %v4463_v8 = vsub.f32 %v4305_v43, %v503_v39  ;;  %v4466_v50 = vsub.f32 %v4308_v44, %v503_v39  ;;  %v607_v12 = vadd.f32 %v563_v38, %v562_v37  ;;  %v3353_v44 = vld [vmem:[#allocation6 + $0x244] ss:$24 sps:$4 sm:$0xff]   ;;  %1543 = vmatprep.subr.bf16.mxu1 %v3355_v53  ;;  %v3379_v36 = vld [vmem:[#allocation6 + $0x14] ss:$24 sps:$4 sm:$0xff]   ;;  %v697_v38 = vlaneseq }
 0x15b   : > { %602 = vadd.xlane.f32.xlu1 %v601_v33  ;;  %605 = vadd.xlane.f32.xlu0 %v604_v25  ;;  %v564_v40 = vmul.f32 %v4457_v23, %v4457_v23  ;;  %v565_v41 = vmul.f32 %v4460_v6, %v4460_v6  ;;  %v3375_v33 = vld [vmem:[#allocation6 + $0x2d0] ss:$24 sps:$4 sm:$0xff]  }
 0x15c   : > { %v566_v13 = vmul.f32 %v4463_v8, %v4463_v8  ;;  %v567_v43 = vmul.f32 %v4466_v50, %v4466_v50  ;;  %1430 = vmatprep.subr.bf16.mxu0 %v3353_v44 }
 0x15d   : > { %v610_v14 = vadd.f32 %v565_v41, %v564_v40  ;;  %1431 = vmatpush1.bf16.msra.mxu0 %v3357_v28  ;;  %1544 = vmatpush1.bf16.msra.mxu1 %v3358_v29 }
 0x15e   : > { %v613_v15 = vadd.f32 %v567_v43, %v566_v13  ;;  %1432 = vmatprep.subr.bf16.mxu0 %v3359_v31  ;;  %1545 = vmatprep.subr.bf16.mxu1 %v3361_v56  ;;  %v437_v31 = vld [vmem:[%s5168_s1] sm:$0x3] }
 0x15f   : > { %608 = vadd.xlane.f32.xlu1 %v607_v12  ;;  %611 = vadd.xlane.f32.xlu0 %v610_v14  ;;  %v4476_v12 = vshrl.u32 %v697_v38, 7 }
 0x161   : > { %1433 = vmatpush1.bf16.msra.mxu0 %v3363_v32  ;;  %1546 = vmatpush1.bf16.msra.mxu1 %v3364_v63  ;;  %v4479_v14 = vsub.s32 1, %v4476_v12  ;;  %v4482_v28 = vsub.s32 0, %v4476_v12 }
 0x162   : > { %1434 = vmatprep.subr.bf16.mxu0 %v3365_v10  ;;  %1547 = vmatprep.subr.bf16.mxu1 %v3367_v18 }
 0x163   : > { %614 = vadd.xlane.f32.xlu1 %v613_v15  ;;  %v4488_v18 = vrot.slane %v437_v31, %v4479_v14 }
 0x165   : > { %1435 = vmatpush1.bf16.msra.mxu0 %v3369_v19  ;;  %1548 = vmatpush1.bf16.msra.mxu1 %v3370_v21 }
 0x166   : > { %1436 = vmatprep.subr.bf16.mxu0 %v3371_v16  ;;  %1549 = vmatprep.subr.bf16.mxu1 %v3373_v34  ;;  %v438_v16 = vld [vmem:[%s5169_s2] sm:$0x3]  ;;  %v4494_v34 = vrot.slane %v437_v31, %v4482_v28 }
 0x169   : > { %1437 = vmatpush1.bf16.msra.mxu0 %v3375_v33  ;;  %1550 = vmatpush1.bf16.msra.mxu1 %v3376_v35 }
 0x16a   : > { %1632 = vmatprep.subr.bf16.mxu0 %v3379_v36  ;;  %3117 = vmatprep.subr.bf16.mxu1 %v3379_v36 }
 0x1d0   : > { %v570_v39 = vpop.xlane.xlu0 %569 }
 0x1d1   : > { %v616_v37 = vmul.f32 0.00390625, %v570_v39 }
 0x1d3   : > { %v632_v5 = vadd.f32 1e-05, %v616_v37 }
 0x1d4   : > { %v573_v22 = vpop.xlane.xlu1 %572  ;;  %v576_v25 = vpop.xlane.xlu0 %575 }
 0x1d5   : > { %3425 = vrsqrt.f32 %v632_v5  ;;  %v617_v26 = vmul.f32 0.00390625, %v573_v22  ;;  %v618_v42 = vmul.f32 0.00390625, %v576_v25  ;;  %v4500_v22 = vrot.slane %v438_v16, %v4479_v14 }
 0x1d7   : > { %v633_v40 = vadd.f32 1e-05, %v617_v26  ;;  %v634_v41 = vadd.f32 1e-05, %v618_v42 }
 0x1d8   : > { %v579_v13 = vpop.xlane.xlu1 %578  ;;  %v582_v43 = vpop.xlane.xlu0 %581 }
 0x1d9   : > { %3427 = vrsqrt.f32 %v633_v40  ;;  %v619_v44 = vmul.f32 0.00390625, %v579_v13  ;;  %v620_v53 = vmul.f32 0.00390625, %v582_v43  ;;  %v4504_v40 = vrot.slane %v438_v16, %v4482_v28 }
 0x1da   : > { %3429 = vrsqrt.f32 %v634_v41 }
 0x1db   : > { %v635_v29 = vadd.f32 1e-05, %v619_v44  ;;  %v636_v15 = vadd.f32 1e-05, %v620_v53 }
 0x1dc   : > { %v585_v56 = vpop.xlane.xlu1 %584  ;;  %v588_v32 = vpop.xlane.xlu0 %587 }
 0x1dd   : > { %3431 = vrsqrt.f32 %v635_v29  ;;  %v621_v63 = vmul.f32 0.00390625, %v585_v56  ;;  %v622_v10 = vmul.f32 0.00390625, %v588_v32 }
 0x1de   : > { %3433 = vrsqrt.f32 %v636_v15 }
 0x1df   : > { %v3426_v19 = vpop.eup %3425  ;;  %v637_v21 = vadd.f32 1e-05, %v621_v63  ;;  %v638_v37 = vadd.f32 1e-05, %v622_v10 }
 0x1e0   : > { %v591_v33 = vpop.xlane.xlu1 %590  ;;  %v665_v35 = vmul.f32 %v3426_v19, %v4320_v59  ;;  %v664_v36 = vmul.f32 %v3426_v19, %v4317_v58  ;;  %v594_v38 = vpop.xlane.xlu0 %593 }
 0x1e1   : > { %3435 = vrsqrt.f32 %v637_v21  ;;  %v623_v39 = vmul.f32 0.00390625, %v591_v33  ;;  %v624_v43 = vmul.f32 0.00390625, %v594_v38 }
 0x1e2   : > { %v708_v5 = vmul.f32 %v4488_v18, %v665_v35  ;;  %v707_v42 = vmul.f32 %v4494_v34, %v664_v36  ;;  %v3377_v36 = vld [vmem:[#allocation6 + $0x10] ss:$24 sps:$4 sm:$0xff]  }
 0x1e3   : > { %v3428_v25 = vpop.eup %3427  ;;  %v639_v26 = vadd.f32 1e-05, %v623_v39  ;;  %v640_v33 = vadd.f32 1e-05, %v624_v43 }
 0x1e4   : > { %v3430_v41 = vpop.eup %3429  ;;  %v597_v59 = vpop.xlane.xlu1 %596  ;;  %v667_v58 = vmul.f32 %v3428_v25, %v4340_v4  ;;  %v666_v13 = vmul.f32 %v3428_v25, %v4337_v11  ;;  %v751_v15 = vadd.f32 %v4500_v22, %v708_v5  ;;  %v750_v63 = vadd.f32 %v4504_v40, %v707_v42 }
 0x1e5   : > { %3437 = vrsqrt.f32 %v639_v26  ;;  %v625_v44 = vmul.f32 0.00390625, %v597_v59  ;;  %v669_v53 = vmul.f32 %v3430_v41, %v4326_v61  ;;  %v668_v11 = vmul.f32 %v3430_v41, %v4323_v60  ;;  %v600_v60 = vpop.xlane.xlu0 %599  ;;  %v3382_v26 = vld [vmem:[#allocation6 + $0x44] ss:$24 sps:$4 sm:$0xff]  }
 0x1e6   : > { %3439 = vrsqrt.f32 %v638_v37  ;;  %v710_v29 = vmul.f32 %v4488_v18, %v667_v58  ;;  %v709_v31 = vmul.f32 %v4494_v34, %v666_v13  ;;  %v626_v13 = vmul.f32 0.00390625, %v600_v60 }
 0x1e7   : > { %v3432_v56 = vpop.eup %3431  ;;  %v641_v32 = vadd.f32 1e-05, %v625_v44  ;;  %v712_v4 = vmul.f32 %v4488_v18, %v669_v53  ;;  %v3380_v44 = vld [vmem:[#allocation6 + $0x40] ss:$24 sps:$4 sm:$0xff]  }
 0x1e8   : > { %v753_v10 = vadd.f32 %v4500_v22, %v710_v29  ;;  %v752_v19 = vadd.f32 %v4504_v40, %v709_v31  ;;  %v671_v61 = vmul.f32 %v3432_v56, %v4346_v24  ;;  %v670_v21 = vmul.f32 %v3432_v56, %v4343_v17  ;;  %v3434_v16 = vpop.eup %3433  ;;  %v603_v35 = vpop.xlane.xlu1 %602 }
 0x1e9   : > { %3441 = vrsqrt.f32 %v641_v32  ;;  %v755_v25 = vadd.f32 %v4500_v22, %v712_v4  ;;  %v711_v24 = vmul.f32 %v4494_v34, %v668_v11  ;;  %v627_v42 = vmul.f32 0.00390625, %v603_v35  ;;  %v606_v4 = vpop.xlane.xlu0 %605 }
 0x1ea   : > { %v4519_v39 = vpack.c.bf16 %v753_v10, %v751_v15  ;;  %v4521_v37 = vpack.c.bf16 %v752_v19, %v750_v63  ;;  %v714_v38 = vmul.f32 %v4488_v18, %v671_v61  ;;  %v713_v17 = vmul.f32 %v4494_v34, %v670_v21  ;;  %v3385_v15 = vld [vmem:[#allocation6 + $0x74] ss:$24 sps:$4 sm:$0xff]   ;;  %v3383_v21 = vld [vmem:[#allocation6 + $0x70] ss:$24 sps:$4 sm:$0xff]  }
 0x1eb   : > { %v3436_v5 = vpop.eup %3435  ;;  %v673_v59 = vmul.f32 %v3434_v16, %v4360_v45  ;;  %3443 = vrsqrt.f32 %v640_v33  ;;  %v643_v56 = vadd.f32 1e-05, %v627_v42  ;;  %v754_v32 = vadd.f32 %v4504_v40, %v711_v24  ;;  %v3386_v24 = vld [vmem:[#allocation6 + $0xa0] ss:$24 sps:$4 sm:$0xff]  }
 0x1ec   : > { %1438 = vmatprep.mubr.bf16.mxu0 %v4519_v39  ;;  %1551 = vmatprep.mubr.bf16.mxu1 %v4519_v39  ;;  %v757_v41 = vadd.f32 %v4500_v22, %v714_v38  ;;  %v675_v58 = vmul.f32 %v3436_v5, %v4366_v48  ;;  %v756_v53 = vadd.f32 %v4504_v40, %v713_v17  ;;  %v609_v11 = vpop.xlane.xlu1 %608  ;;  %v642_v61 = vadd.f32 1e-05, %v626_v13  ;;  %v3391_v17 = vld [vmem:[#allocation6 + $0xd4] ss:$24 sps:$4 sm:$0xff]  }
 0x1ed   : > { %1439 = vmatmul.mubr.bf16.vlgmr.msra.gmra.mrb[0].mxu0 %v4521_v37  ;;  %1552 = vmatmul.mubr.bf16.vlgmr.msra.gmra.mrb[0].mxu1 %v4521_v37  ;;  %v716_v45 = vmul.f32 %v4488_v18, %v673_v59  ;;  %v674_v63 = vmul.f32 %v3436_v5, %v4363_v47  ;;  %v672_v19 = vmul.f32 %v3434_v16, %v4357_v9  ;;  %3445 = vrsqrt.f32 %v643_v56  ;;  %v3388_v9 = vld [vmem:[#allocation6 + $0xa4] ss:$24 sps:$4 sm:$0xff]   ;;  %v3389_v56 = vld [vmem:[#allocation6 + $0xd0] ss:$24 sps:$4 sm:$0xff]  }
 0x1ee   : > { %1633 = vmatpush1.bf16.msra.mxu0 %v3377_v36  ;;  %3133 = vmatpush1.bf16.msra.mxu1 %v3377_v36  ;;  %v4534_v43 = vpack.c.bf16 %v757_v41, %v755_v25  ;;  %v718_v48 = vmul.f32 %v4488_v18, %v675_v58  ;;  %v4545_v33 = vpack.c.bf16 %v756_v53, %v754_v32  ;;  %v628_v5 = vmul.f32 0.00390625, %v606_v4 }
 0x1ef   : > { %v3438_v29 = vpop.eup %3437  ;;  %1634 = vmatprep.subr.bf16.mxu0 %v3382_v26  ;;  %3118 = vmatprep.subr.bf16.mxu1 %v3382_v26  ;;  %v759_v36 = vadd.f32 %v4500_v22, %v716_v45  ;;  %v717_v47 = vmul.f32 %v4494_v34, %v674_v63  ;;  %v629_v60 = vmul.f32 0.00390625, %v609_v11  ;;  %3447 = vrsqrt.f32 %v642_v61  ;;  %v612_v63 = vpop.xlane.xlu0 %611  ;;  %v3392_v61 = vld [vmem:[#allocation6 + $0x100] ss:$24 sps:$4 sm:$0xff]  }
 0x1f0   : > { %v3440_v31 = vpop.eup %3439  ;;  %1448 = vmatprep.mubr.bf16.mxu0 %v4534_v43  ;;  %1561 = vmatprep.mubr.bf16.mxu1 %v4534_v43  ;;  %v761_v10 = vadd.f32 %v4500_v22, %v718_v48  ;;  %v679_v35 = vmul.f32 %v3438_v29, %v4386_v62  ;;  %v715_v62 = vmul.f32 %v4494_v34, %v672_v19  ;;  %v644_v58 = vadd.f32 1e-05, %v628_v5 }
 0x1f1   : > { %v677_v38 = vmul.f32 %v3440_v31, %v4380_v55  ;;  %v760_v42 = vadd.f32 %v4504_v40, %v717_v47  ;;  %v678_v59 = vmul.f32 %v3438_v29, %v4383_v57  ;;  %v645_v13 = vadd.f32 1e-05, %v629_v60 }
 0x1f2   : > { %1635 = vmatpush1.bf16.msra.mxu0 %v3380_v44  ;;  %3134 = vmatpush1.bf16.msra.mxu1 %v3380_v44  ;;  %v4553_v25 = vpack.c.bf16 %v761_v10, %v759_v36  ;;  %v722_v26 = vmul.f32 %v4488_v18, %v679_v35  ;;  %v615_v44 = vpop.xlane.xlu1 %614  ;;  %v758_v53 = vadd.f32 %v4504_v40, %v715_v62  ;;  %v3394_v10 = vld [vmem:[#allocation6 + $0x104] ss:$24 sps:$4 sm:$0xff]   ;;  %v630_v19 = vmul.f32 0.00390625, %v612_v63  ;;  %v3397_v35 = vld [vmem:[#allocation6 + $0x134] ss:$24 sps:$4 sm:$0xff]  }
 0x1f3   : > { %1636 = vmatprep.subr.bf16.mxu0 %v3385_v15  ;;  %3119 = vmatprep.subr.bf16.mxu1 %v3385_v15  ;;  %v3442_v16 = vpop.eup %3441  ;;  %v720_v41 = vmul.f32 %v4488_v18, %v677_v38  ;;  %v676_v45 = vmul.f32 %v3440_v31, %v4377_v54  ;;  %v721_v4 = vmul.f32 %v4494_v34, %v678_v59  ;;  %3449 = vrsqrt.f32 %v645_v13  ;;  %v3400_v59 = vld [vmem:[#allocation6 + $0x164] ss:$24 sps:$4 sm:$0xff]   ;;  %v3398_v13 = vld [vmem:[#allocation6 + $0x160] ss:$24 sps:$4 sm:$0xff]  }
 0x1f4   : > { %v765_v15 = vadd.f32 %v4500_v22, %v722_v26  ;;  %v683_v48 = vmul.f32 %v3442_v16, %v4406_v30  ;;  %v4567_v57 = vpack.c.bf16 %v760_v42, %v758_v53  ;;  %v631_v11 = vmul.f32 0.00390625, %v615_v44 }
 0x1f5   : > { %1449 = vmatmul.mubr.bf16.gmra.mrb[4].mxu0 %v4545_v33  ;;  %1562 = vmatmul.mubr.bf16.gmra.mrb[4].mxu1 %v4545_v33  ;;  %v3444_v55 = vpop.eup %3443  ;;  %v763_v29 = vadd.f32 %v4500_v22, %v720_v41  ;;  %3451 = vrsqrt.f32 %v644_v58  ;;  %v764_v36 = vadd.f32 %v4504_v40, %v721_v4  ;;  %v682_v47 = vmul.f32 %v3442_v16, %v4403_v27 }
 0x1f6   : > { %1637 = vmatpush1.bf16.msra.mxu0 %v3383_v21  ;;  %3135 = vmatpush1.bf16.msra.mxu1 %v3383_v21  ;;  %v681_v32 = vmul.f32 %v3444_v55, %v4400_v2  ;;  %v719_v2 = vmul.f32 %v4494_v34, %v676_v45  ;;  %v726_v30 = vmul.f32 %v4488_v18, %v683_v48  ;;  %v647_v5 = vadd.f32 1e-05, %v631_v11 }
 0x1f7   : > { %1458 = vmatprep.mubr.bf16.mxu0 %v4553_v25  ;;  %1571 = vmatprep.mubr.bf16.mxu1 %v4553_v25  ;;  %v4573_v54 = vpack.c.bf16 %v765_v15, %v763_v29  ;;  %v3446_v31 = vpop.eup %3445  ;;  %v680_v62 = vmul.f32 %v3444_v55, %v4397_v1  ;;  %v725_v16 = vmul.f32 %v4494_v34, %v682_v47  ;;  %v3401_v29 = vld [vmem:[#allocation6 + $0x190] ss:$24 sps:$4 sm:$0xff]  }
 0x1f8   : > { %1638 = vmatprep.subr.bf16.mxu0 %v3388_v9  ;;  %3120 = vmatprep.subr.bf16.mxu1 %v3388_v9  ;;  %v724_v21 = vmul.f32 %v4488_v18, %v681_v32  ;;  %v762_v60 = vadd.f32 %v4504_v40, %v719_v2  ;;  %v769_v9 = vadd.f32 %v4500_v22, %v726_v30  ;;  %3453 = vrsqrt.f32 %v647_v5  ;;  %v3406_v2 = vld [vmem:[#allocation6 + $0x1c4] ss:$24 sps:$4 sm:$0xff]  }
 0x1f9   : > { %v3448_v38 = vpop.eup %3447  ;;  %v687_v26 = vmul.f32 %v3446_v31, %v4426_v52  ;;  %v723_v52 = vmul.f32 %v4494_v34, %v680_v62  ;;  %v768_v53 = vadd.f32 %v4504_v40, %v725_v16  ;;  %v686_v45 = vmul.f32 %v3446_v31, %v4423_v51  ;;  %v3404_v31 = vld [vmem:[#allocation6 + $0x1c0] ss:$24 sps:$4 sm:$0xff]  }
 0x1fa   : > { %1639 = vmatpush1.bf16.msra.mxu0 %v3386_v24  ;;  %3136 = vmatpush1.bf16.msra.mxu1 %v3386_v24  ;;  %v646_v24 = vadd.f32 1e-05, %v630_v19  ;;  %v767_v42 = vadd.f32 %v4500_v22, %v724_v21  ;;  %v4587_v27 = vpack.c.bf16 %v764_v36, %v762_v60  ;;  %v685_v41 = vmul.f32 %v3448_v38, %v4420_v49  ;;  %v3403_v49 = vld [vmem:[#allocation6 + $0x194] ss:$24 sps:$4 sm:$0xff]   ;;  %v3410_v16 = vld [vmem:[#allocation6 + $0x220] ss:$24 sps:$4 sm:$0xff]  }
 0x1fb   : > { %1640 = vmatprep.subr.bf16.mxu0 %v3391_v17  ;;  %3121 = vmatprep.subr.bf16.mxu1 %v3391_v17  ;;  %v3395_v17 = vld [vmem:[#allocation6 + $0x130] ss:$24 sps:$4 sm:$0xff]   ;;  %v730_v55 = vmul.f32 %v4488_v18, %v687_v26  ;;  %v766_v48 = vadd.f32 %v4504_v40, %v723_v52  ;;  %v684_v32 = vmul.f32 %v3448_v38, %v4417_v46 }
 0x1fc   : > { %v4593_v1 = vpack.c.bf16 %v769_v9, %v767_v42  ;;  %3455 = vrsqrt.f32 %v646_v24  ;;  %v728_v15 = vmul.f32 %v4488_v18, %v685_v41  ;;  %v3407_v9 = vld [vmem:[#allocation6 + $0x1f0] ss:$24 sps:$4 sm:$0xff]   ;;  %v3415_v41 = vld [vmem:[#allocation6 + $0x254] ss:$24 sps:$4 sm:$0xff]  }
 0x1fd   : > { %1459 = vmatmul.mubr.bf16.gmra.mrb[8].mxu0 %v4567_v57  ;;  %1572 = vmatmul.mubr.bf16.gmra.mrb[8].mxu1 %v4567_v57  ;;  %v3450_v58 = vpop.eup %3449  ;;  %v4607_v11 = vpack.c.bf16 %v768_v53, %v766_v48  ;;  %v3416_v48 = vld [vmem:[#allocation6 + $0x280] ss:$24 sps:$4 sm:$0xff]  }
 0x1fe   : > { %1641 = vmatpush1.bf16.msra.mxu0 %v3389_v56  ;;  %3137 = vmatpush1.bf16.msra.mxu1 %v3389_v56  ;;  %v773_v56 = vadd.f32 %v4500_v22, %v730_v55  ;;  %v691_v63 = vmul.f32 %v3450_v58, %v4446_v20  ;;  %v771_v51 = vadd.f32 %v4500_v22, %v728_v15  ;;  %v3418_v15 = vld [vmem:[#allocation6 + $0x284] ss:$24 sps:$4 sm:$0xff]  }
 0x1ff   : > { %1468 = vmatprep.mubr.bf16.mxu0 %v4573_v54  ;;  %1581 = vmatprep.mubr.bf16.mxu1 %v4573_v54  ;;  %v3452_v44 = vpop.eup %3451  ;;  %v727_v20 = vmul.f32 %v4494_v34, %v684_v32  ;;  %v3419_v32 = vld [vmem:[#allocation6 + $0x2b0] ss:$24 sps:$4 sm:$0xff]  }
 0x200   : > { %1642 = vmatprep.subr.bf16.mxu0 %v3394_v10  ;;  %3122 = vmatprep.subr.bf16.mxu1 %v3394_v10  ;;  %v689_v4 = vmul.f32 %v3452_v44, %v4440_v7  ;;  %v729_v10 = vmul.f32 %v4494_v34, %v686_v45  ;;  %v4613_v46 = vpack.c.bf16 %v773_v56, %v771_v51 }
 0x201   : > { %v734_v30 = vmul.f32 %v4488_v18, %v691_v63  ;;  %v770_v47 = vadd.f32 %v4504_v40, %v727_v20  ;;  %v688_v5 = vmul.f32 %v3452_v44, %v4437_v3  ;;  %v3413_v44 = vld [vmem:[#allocation6 + $0x250] ss:$24 sps:$4 sm:$0xff]  }
 0x202   : > { %1643 = vmatpush1.bf16.msra.mxu0 %v3392_v61  ;;  %3138 = vmatpush1.bf16.msra.mxu1 %v3392_v61  ;;  %v3454_v7 = vpop.eup %3453  ;;  %v732_v19 = vmul.f32 %v4488_v18, %v689_v4  ;;  %v3409_v61 = vld [vmem:[#allocation6 + $0x1f4] ss:$24 sps:$4 sm:$0xff]   ;;  %v772_v21 = vadd.f32 %v4504_v40, %v729_v10 }
 0x203   : > { %1644 = vmatprep.subr.bf16.mxu0 %v3397_v35  ;;  %3123 = vmatprep.subr.bf16.mxu1 %v3397_v35  ;;  %v690_v35 = vmul.f32 %v3450_v58, %v4443_v0  ;;  %v777_v38 = vadd.f32 %v4500_v22, %v734_v30  ;;  %v695_v60 = vmul.f32 %v3454_v7, %v4466_v50 }
 0x204   : > { %v775_v62 = vadd.f32 %v4500_v22, %v732_v19  ;;  %v4627_v26 = vpack.c.bf16 %v772_v21, %v770_v47  ;;  %v731_v50 = vmul.f32 %v4494_v34, %v688_v5  ;;  %v694_v52 = vmul.f32 %v3454_v7, %v4463_v8 }
 0x205   : > { %1469 = vmatmul.mubr.bf16.gmra.mrb[12].mxu0 %v4587_v27  ;;  %1582 = vmatmul.mubr.bf16.gmra.mrb[12].mxu1 %v4587_v27  ;;  %v733_v0 = vmul.f32 %v4494_v34, %v690_v35  ;;  %v738_v42 = vmul.f32 %v4488_v18, %v695_v60 }
 0x206   : > { %1645 = vmatpush1.bf16.msra.mxu0 %v3395_v17  ;;  %3139 = vmatpush1.bf16.msra.mxu1 %v3395_v17  ;;  %v3456_v36 = vpop.eup %3455  ;;  %v3412_v17 = vld [vmem:[#allocation6 + $0x224] ss:$24 sps:$4 sm:$0xff]   ;;  %v4633_v3 = vpack.c.bf16 %v777_v38, %v775_v62  ;;  %v774_v55 = vadd.f32 %v4504_v40, %v731_v50 }
 0x207   : > { %1478 = vmatprep.mubr.bf16.mxu0 %v4593_v1  ;;  %1591 = vmatprep.mubr.bf16.mxu1 %v4593_v1  ;;  %v693_v24 = vmul.f32 %v3456_v36, %v4460_v6  ;;  %v776_v6 = vadd.f32 %v4504_v40, %v733_v0  ;;  %v781_v58 = vadd.f32 %v4500_v22, %v738_v42 }
 0x208   : > { %1646 = vmatprep.subr.bf16.mxu0 %v3400_v59  ;;  %3124 = vmatprep.subr.bf16.mxu1 %v3400_v59 }
 0x209   : > { %v736_v59 = vmul.f32 %v4488_v18, %v693_v24  ;;  %v737_v18 = vmul.f32 %v4494_v34, %v694_v52 }
 0x20a   : > { %1647 = vmatpush1.bf16.msra.mxu0 %v3398_v13  ;;  %3140 = vmatpush1.bf16.msra.mxu1 %v3398_v13  ;;  %v692_v13 = vmul.f32 %v3456_v36, %v4457_v23  ;;  %v3421_v23 = vld [vmem:[#allocation6 + $0x2b4] ss:$24 sps:$4 sm:$0xff]  }
 0x20b   : > { %1648 = vmatprep.subr.bf16.mxu0 %v3403_v49  ;;  %3125 = vmatprep.subr.bf16.mxu1 %v3403_v49  ;;  %v794_v49 = vpack.c.bf16 %v776_v6, %v774_v55  ;;  %v779_v53 = vadd.f32 %v4500_v22, %v736_v59  ;;  %v780_v56 = vadd.f32 %v4504_v40, %v737_v18 }
 0x20c   : > { %v735_v45 = vmul.f32 %v4494_v34, %v692_v13  ;;  %v3422_v34 = vld [vmem:[#allocation6 + $0x2e0] ss:$24 sps:$4 sm:$0xff]  }
 0x20d   : > { %1479 = vmatmul.mubr.bf16.gmra.mrb[16].mxu0 %v4607_v11  ;;  %1592 = vmatmul.mubr.bf16.gmra.mrb[16].mxu1 %v4607_v11  ;;  %v797_v8 = vpack.c.bf16 %v781_v58, %v779_v53 }
 0x20e   : > { %1649 = vmatpush1.bf16.msra.mxu0 %v3401_v29  ;;  %3141 = vmatpush1.bf16.msra.mxu1 %v3401_v29  ;;  %v778_v22 = vadd.f32 %v4504_v40, %v735_v45  ;;  %v3424_v29 = vld [vmem:[#allocation6 + $0x2e4] ss:$24 sps:$4 sm:$0xff]   ;;  %v906_v40 = vsub.s32 2, %v4476_v12 }
 0x20f   : > { %1488 = vmatprep.mubr.bf16.mxu0 %v4613_v46  ;;  %1601 = vmatprep.mubr.bf16.mxu1 %v4613_v46 }
 0x210   : > { %1650 = vmatprep.subr.bf16.mxu0 %v3406_v2  ;;  %3126 = vmatprep.subr.bf16.mxu1 %v3406_v2  ;;  %v796_v63 = vpack.c.bf16 %v780_v56, %v778_v22 }
 0x212   : > { %1651 = vmatpush1.bf16.msra.mxu0 %v3404_v31  ;;  %3142 = vmatpush1.bf16.msra.mxu1 %v3404_v31 }
 0x213   : > { %1652 = vmatprep.subr.bf16.mxu0 %v3409_v61  ;;  %3127 = vmatprep.subr.bf16.mxu1 %v3409_v61 }
 0x215   : > { %1489 = vmatmul.mubr.bf16.gmra.mrb[20].mxu0 %v4627_v26  ;;  %1602 = vmatmul.mubr.bf16.gmra.mrb[20].mxu1 %v4627_v26 }
 0x216   : > { %1653 = vmatpush1.bf16.msra.mxu0 %v3407_v9  ;;  %3143 = vmatpush1.bf16.msra.mxu1 %v3407_v9 }
 0x217   : > { %1498 = vmatprep.mubr.bf16.mxu0 %v4633_v3  ;;  %1611 = vmatprep.mubr.bf16.mxu1 %v4633_v3 }
 0x218   : > { %1654 = vmatprep.subr.bf16.mxu0 %v3412_v17  ;;  %3128 = vmatprep.subr.bf16.mxu1 %v3412_v17 }
 0x21a   : > { %1655 = vmatpush1.bf16.msra.mxu0 %v3410_v16  ;;  %3144 = vmatpush1.bf16.msra.mxu1 %v3410_v16 }
 0x21b   : > { %1656 = vmatprep.subr.bf16.mxu0 %v3415_v41  ;;  %3129 = vmatprep.subr.bf16.mxu1 %v3415_v41 }
 0x21d   : > { %1499 = vmatmul.mubr.bf16.gmra.mrb[24].mxu0 %v794_v49  ;;  %1612 = vmatmul.mubr.bf16.gmra.mrb[24].mxu1 %v794_v49 }
 0x21e   : > { %1657 = vmatpush1.bf16.msra.mxu0 %v3413_v44  ;;  %3145 = vmatpush1.bf16.msra.mxu1 %v3413_v44 }
 0x21f   : > { %1508 = vmatprep.mubr.bf16.mxu0 %v797_v8  ;;  %1621 = vmatprep.mubr.bf16.mxu1 %v797_v8 }
 0x220   : > { %1658 = vmatprep.subr.bf16.mxu0 %v3418_v15  ;;  %3130 = vmatprep.subr.bf16.mxu1 %v3418_v15 }
 0x222   : > { %1659 = vmatpush1.bf16.msra.mxu0 %v3416_v48  ;;  %3146 = vmatpush1.bf16.msra.mxu1 %v3416_v48 }
 0x223   : > { %1660 = vmatprep.subr.bf16.mxu0 %v3421_v23  ;;  %3131 = vmatprep.subr.bf16.mxu1 %v3421_v23 }
 0x225   : > { %1509 = vmatmul.mubr.bf16.gmra.mrb[28].mxu0 %v796_v63  ;;  %1622 = vmatmul.mubr.bf16.gmra.mrb[28].mxu1 %v796_v63 }
 0x226   : > { %1661 = vmatpush1.bf16.msra.mxu0 %v3419_v32  ;;  %3147 = vmatpush1.bf16.msra.mxu1 %v3419_v32 }
 0x227   : > { %1664 = vmatprep.mubr.bf16.mxu0 %v4519_v39  ;;  %1704 = vmatprep.mubr.bf16.mxu1 %v4593_v1  ;;  %v4667_v39 = vld [vmem:[%s5223_s29] sm:$0x3f] }
 0x228   : > { %1662 = vmatprep.subr.bf16.mxu0 %v3424_v29  ;;  %3132 = vmatprep.subr.bf16.mxu1 %v3424_v29 }
 0x22a   : > { %1663 = vmatpush1.bf16.msra.mxu0 %v3422_v34  ;;  %3148 = vmatpush1.bf16.msra.mxu1 %v3422_v34 }
 0x22d   : > { %1665 = vmatmul.mubr.bf16.vlgmr.msra.gmra.mrb[32].mxu0 %v4521_v37  ;;  %1705 = vmatmul.mubr.bf16.vlgmr.msra.gmra.mrb[32].mxu1 %v4607_v11  ;;  %v910_v37 = vsub.s32 3, %v4476_v12 }
 0x22e   : > { %1674 = vmatprep.mubr.bf16.mxu0 %v4534_v43  ;;  %1714 = vmatprep.mubr.bf16.mxu1 %v4613_v46  ;;  %v4672_v43 = vrot.slane %v4667_v39, %v4482_v28 }
 0x235   : > { %1675 = vmatmul.mubr.bf16.gmra.mrb[36].mxu0 %v4545_v33  ;;  %1715 = vmatmul.mubr.bf16.gmra.mrb[36].mxu1 %v4627_v26  ;;  %v4675_v33 = vrot.slane %v4667_v39, %v906_v40 }
 0x236   : > { %1684 = vmatprep.mubr.bf16.mxu0 %v4553_v25  ;;  %1724 = vmatprep.mubr.bf16.mxu1 %v4633_v3 }
 0x23d   : > { %1685 = vmatmul.mubr.bf16.gmra.mrb[40].mxu0 %v4567_v57  ;;  %1725 = vmatmul.mubr.bf16.gmra.mrb[40].mxu1 %v794_v49 }
 0x23e   : > { %1694 = vmatprep.mubr.bf16.mxu0 %v4573_v54  ;;  %1734 = vmatprep.mubr.bf16.mxu1 %v797_v8  ;;  %v4679_v54 = vrot.slane %v4667_v39, %v4479_v14 }
 0x245   : > { %1695 = vmatmul.mubr.bf16.gmra.mrb[44].mxu0 %v4587_v27  ;;  %1735 = vmatmul.mubr.bf16.gmra.mrb[44].mxu1 %v796_v63  ;;  %v4682_v27 = vrot.slane %v4667_v39, %v910_v37 }
 0x2c0   : > { %v1440_v25 = vpop.f32.mrb[0].mxu0  ;;  %v1553_v57 = vpop.f32.mrb[0].mxu1 }
 0x2c1   : > { %v1442_v1 = vpop.f32.mrb[1].mxu0  ;;  %v1555_v4 = vpop.f32.mrb[1].mxu1  ;;  %v1441_v10 = vadd.f32 %v1440_v25, %v4672_v43  ;;  %v1554_v28 = vadd.f32 %v1553_v57, %v4675_v33 }
 0x2c2   : > { %v1444_v11 = vpop.f32.mrb[2].mxu0  ;;  %v1557_v51 = vpop.f32.mrb[2].mxu1  ;;  %v1443_v14 = vadd.f32 %v1442_v1, %v4679_v54  ;;  %v1556_v7 = vadd.f32 %v1555_v4, %v4682_v27 }
 0x2c3   : > { %v1445_v2 = vadd.f32 %v1444_v11, %v4672_v43  ;;  %v1558_v46 = vadd.f32 %v1557_v51, %v4675_v33  ;;  %v1446_v20 = vpop.f32.mrb[3].mxu0  ;;  %v1559_v30 = vpop.f32.mrb[3].mxu1 }
 0x2c4   : > { %v1447_v31 = vadd.f32 %v1446_v20, %v4679_v54  ;;  %v1560_v19 = vadd.f32 %v1559_v30, %v4682_v27 }
 0x2c5   : > { %v1745_v61 = vpack.c.bf16 %v1445_v2, %v1441_v10  ;;  %v1747_v21 = vpack.c.bf16 %v1558_v46, %v1554_v28 }
 0x2c6   : > { %v1746_v35 = vpack.c.bf16 %v1447_v31, %v1443_v14  ;;  %v1748_v36 = vpack.c.bf16 %v1560_v19, %v1556_v7 }
 0x2c7   : > { %1793 = vst [vmem:[#allocation2] sm:$0xff] %v1745_v61  ;;  %1795 = vst [vmem:[#allocation2 + $0x10] sm:$0xff] %v1747_v21 }
 0x2c8   : > { %1794 = vst [vmem:[#allocation2 + $0x8] sm:$0xff] %v1746_v35  ;;  %1796 = vst [vmem:[#allocation2 + $0x18] sm:$0xff] %v1748_v36  ;;  %v1450_v47 = vpop.f32.mrb[4].mxu0  ;;  %v1563_v38 = vpop.f32.mrb[4].mxu1 }
 0x2c9   : > { %v1452_v5 = vpop.f32.mrb[5].mxu0  ;;  %v1565_v60 = vpop.f32.mrb[5].mxu1  ;;  %v1451_v26 = vadd.f32 %v1450_v47, %v4672_v43  ;;  %v1564_v0 = vadd.f32 %v1563_v38, %v4675_v33 }
 0x2ca   : > { %v1454_v9 = vpop.f32.mrb[6].mxu0  ;;  %v1567_v62 = vpop.f32.mrb[6].mxu1  ;;  %v1453_v42 = vadd.f32 %v1452_v5, %v4679_v54  ;;  %v1566_v16 = vadd.f32 %v1565_v60, %v4682_v27 }
 0x2cb   : > { %v1455_v24 = vadd.f32 %v1454_v9, %v4672_v43  ;;  %v1568_v17 = vadd.f32 %v1567_v62, %v4675_v33  ;;  %v1456_v3 = vpop.f32.mrb[7].mxu0  ;;  %v1569_v50 = vpop.f32.mrb[7].mxu1 }
 0x2cc   : > { %v1457_v41 = vadd.f32 %v1456_v3, %v4679_v54  ;;  %v1570_v6 = vadd.f32 %v1569_v50, %v4682_v27 }
 0x2cd   : > { %v1751_v59 = vpack.c.bf16 %v1455_v24, %v1451_v26  ;;  %v1753_v52 = vpack.c.bf16 %v1568_v17, %v1564_v0 }
 0x2ce   : > { %v1752_v55 = vpack.c.bf16 %v1457_v41, %v1453_v42  ;;  %v1754_v58 = vpack.c.bf16 %v1570_v6, %v1566_v16 }
 0x2cf   : > { %1799 = vst [vmem:[#allocation2 + $0x30] sm:$0xff] %v1751_v59  ;;  %1801 = vst [vmem:[#allocation2 + $0x40] sm:$0xff] %v1753_v52 }
 0x2d0   : > { %1800 = vst [vmem:[#allocation2 + $0x38] sm:$0xff] %v1752_v55  ;;  %1802 = vst [vmem:[#allocation2 + $0x48] sm:$0xff] %v1754_v58  ;;  %v1460_v13 = vpop.f32.mrb[8].mxu0  ;;  %v1573_v44 = vpop.f32.mrb[8].mxu1 }
 0x2d1   : > { %v1462_v49 = vpop.f32.mrb[9].mxu0  ;;  %v1575_v53 = vpop.f32.mrb[9].mxu1  ;;  %v1461_v8 = vadd.f32 %v1460_v13, %v4672_v43  ;;  %v1574_v45 = vadd.f32 %v1573_v44, %v4675_v33 }
 0x2d2   : > { %v1464_v18 = vpop.f32.mrb[10].mxu0  ;;  %v1577_v15 = vpop.f32.mrb[10].mxu1  ;;  %v1463_v32 = vadd.f32 %v1462_v49, %v4679_v54  ;;  %v1576_v63 = vadd.f32 %v1575_v53, %v4682_v27 }
 0x2d3   : > { %v1465_v48 = vadd.f32 %v1464_v18, %v4672_v43  ;;  %v1578_v23 = vadd.f32 %v1577_v15, %v4675_v33  ;;  %v1466_v56 = vpop.f32.mrb[11].mxu0  ;;  %v1579_v22 = vpop.f32.mrb[11].mxu1 }
 0x2d4   : > { %v1467_v29 = vadd.f32 %v1466_v56, %v4679_v54  ;;  %v1580_v34 = vadd.f32 %v1579_v22, %v4682_v27 }
 0x2d5   : > { %v1757_v40 = vpack.c.bf16 %v1465_v48, %v1461_v8  ;;  %v1759_v37 = vpack.c.bf16 %v1578_v23, %v1574_v45 }
 0x2d6   : > { %v1758_v25 = vpack.c.bf16 %v1467_v29, %v1463_v32  ;;  %v1760_v57 = vpack.c.bf16 %v1580_v34, %v1576_v63 }
 0x2d7   : > { %1805 = vst [vmem:[#allocation2 + $0x60] sm:$0xff] %v1757_v40  ;;  %1807 = vst [vmem:[#allocation2 + $0x70] sm:$0xff] %v1759_v37 }
 0x2d8   : > { %1806 = vst [vmem:[#allocation2 + $0x68] sm:$0xff] %v1758_v25  ;;  %1808 = vst [vmem:[#allocation2 + $0x78] sm:$0xff] %v1760_v57  ;;  %v1470_v1 = vpop.f32.mrb[12].mxu0  ;;  %v1583_v4 = vpop.f32.mrb[12].mxu1 }
 0x2d9   : > { %v1472_v11 = vpop.f32.mrb[13].mxu0  ;;  %v1585_v51 = vpop.f32.mrb[13].mxu1  ;;  %v1471_v2 = vadd.f32 %v1470_v1, %v4672_v43  ;;  %v1584_v46 = vadd.f32 %v1583_v4, %v4675_v33 }
 0x2da   : > { %v1474_v10 = vpop.f32.mrb[14].mxu0  ;;  %v1587_v28 = vpop.f32.mrb[14].mxu1  ;;  %v1473_v31 = vadd.f32 %v1472_v11, %v4679_v54  ;;  %v1586_v19 = vadd.f32 %v1585_v51, %v4682_v27 }
 0x2db   : > { %v1475_v20 = vadd.f32 %v1474_v10, %v4672_v43  ;;  %v1588_v30 = vadd.f32 %v1587_v28, %v4675_v33  ;;  %v1476_v14 = vpop.f32.mrb[15].mxu0  ;;  %v1589_v7 = vpop.f32.mrb[15].mxu1 }
 0x2dc   : > { %v1477_v61 = vadd.f32 %v1476_v14, %v4679_v54  ;;  %v1590_v21 = vadd.f32 %v1589_v7, %v4682_v27 }
 0x2dd   : > { %v1763_v35 = vpack.c.bf16 %v1475_v20, %v1471_v2  ;;  %v1765_v36 = vpack.c.bf16 %v1588_v30, %v1584_v46 }
 0x2de   : > { %v1764_v47 = vpack.c.bf16 %v1477_v61, %v1473_v31  ;;  %v1766_v38 = vpack.c.bf16 %v1590_v21, %v1586_v19 }
 0x2df   : > { %1811 = vst [vmem:[#allocation2 + $0x90] sm:$0xff] %v1763_v35  ;;  %1813 = vst [vmem:[#allocation2 + $0xa0] sm:$0xff] %v1765_v36 }
 0x2e0   : > { %1812 = vst [vmem:[#allocation2 + $0x98] sm:$0xff] %v1764_v47  ;;  %1814 = vst [vmem:[#allocation2 + $0xa8] sm:$0xff] %v1766_v38  ;;  %v1480_v5 = vpop.f32.mrb[16].mxu0  ;;  %v1593_v60 = vpop.f32.mrb[16].mxu1 }
 0x2e1   : > { %v1482_v9 = vpop.f32.mrb[17].mxu0  ;;  %v1595_v62 = vpop.f32.mrb[17].mxu1  ;;  %v1481_v24 = vadd.f32 %v1480_v5, %v4672_v43  ;;  %v1594_v17 = vadd.f32 %v1593_v60, %v4675_v33 }
 0x2e2   : > { %v1484_v26 = vpop.f32.mrb[18].mxu0  ;;  %v1597_v0 = vpop.f32.mrb[18].mxu1  ;;  %v1483_v41 = vadd.f32 %v1482_v9, %v4679_v54  ;;  %v1596_v6 = vadd.f32 %v1595_v62, %v4682_v27 }
 0x2e3   : > { %v1485_v3 = vadd.f32 %v1484_v26, %v4672_v43  ;;  %v1598_v50 = vadd.f32 %v1597_v0, %v4675_v33  ;;  %v1486_v42 = vpop.f32.mrb[19].mxu0  ;;  %v1599_v16 = vpop.f32.mrb[19].mxu1 }
 0x2e4   : > { %v1487_v59 = vadd.f32 %v1486_v42, %v4679_v54  ;;  %v1600_v52 = vadd.f32 %v1599_v16, %v4682_v27 }
 0x2e5   : > { %v1769_v55 = vpack.c.bf16 %v1485_v3, %v1481_v24  ;;  %v1771_v58 = vpack.c.bf16 %v1598_v50, %v1594_v17  ;;  %v914_v3 = vsub.s32 4, %v4476_v12  ;;  %v918_v50 = vsub.s32 5, %v4476_v12 }
 0x2e6   : > { %v1770_v13 = vpack.c.bf16 %v1487_v59, %v1483_v41  ;;  %v1772_v44 = vpack.c.bf16 %v1600_v52, %v1596_v6 }
 0x2e7   : > { %1817 = vst [vmem:[#allocation2 + $0xc0] sm:$0xff] %v1769_v55  ;;  %1819 = vst [vmem:[#allocation2 + $0xd0] sm:$0xff] %v1771_v58 }
 0x2e8   : > { %1818 = vst [vmem:[#allocation2 + $0xc8] sm:$0xff] %v1770_v13  ;;  %1820 = vst [vmem:[#allocation2 + $0xd8] sm:$0xff] %v1772_v44  ;;  %v1490_v49 = vpop.f32.mrb[20].mxu0  ;;  %v1603_v53 = vpop.f32.mrb[20].mxu1 }
 0x2e9   : > { %v1492_v18 = vpop.f32.mrb[21].mxu0  ;;  %v1605_v15 = vpop.f32.mrb[21].mxu1  ;;  %v1491_v48 = vadd.f32 %v1490_v49, %v4672_v43  ;;  %v1604_v23 = vadd.f32 %v1603_v53, %v4675_v33 }
 0x2ea   : > { %v1494_v8 = vpop.f32.mrb[22].mxu0  ;;  %v1607_v45 = vpop.f32.mrb[22].mxu1  ;;  %v1493_v29 = vadd.f32 %v1492_v18, %v4679_v54  ;;  %v1606_v34 = vadd.f32 %v1605_v15, %v4682_v27 }
 0x2eb   : > { %v1495_v56 = vadd.f32 %v1494_v8, %v4672_v43  ;;  %v1608_v22 = vadd.f32 %v1607_v45, %v4675_v33  ;;  %v1496_v32 = vpop.f32.mrb[23].mxu0  ;;  %v1609_v63 = vpop.f32.mrb[23].mxu1  ;;  %v4754_v8 = vrot.slane %v4667_v39, %v918_v50 }
 0x2ec   : > { %v1497_v40 = vadd.f32 %v1496_v32, %v4679_v54  ;;  %v1610_v37 = vadd.f32 %v1609_v63, %v4682_v27 }
 0x2ed   : > { %v1775_v25 = vpack.c.bf16 %v1495_v56, %v1491_v48  ;;  %v1777_v57 = vpack.c.bf16 %v1608_v22, %v1604_v23 }
 0x2ee   : > { %v1776_v1 = vpack.c.bf16 %v1497_v40, %v1493_v29  ;;  %v1778_v4 = vpack.c.bf16 %v1610_v37, %v1606_v34 }
 0x2ef   : > { %1823 = vst [vmem:[#allocation2 + $0xf0] sm:$0xff] %v1775_v25  ;;  %1825 = vst [vmem:[#allocation2 + $0x100] sm:$0xff] %v1777_v57 }
 0x2f0   : > { %1824 = vst [vmem:[#allocation2 + $0xf8] sm:$0xff] %v1776_v1  ;;  %1826 = vst [vmem:[#allocation2 + $0x108] sm:$0xff] %v1778_v4  ;;  %v1500_v11 = vpop.f32.mrb[24].mxu0  ;;  %v1613_v51 = vpop.f32.mrb[24].mxu1 }
 0x2f1   : > { %v1502_v10 = vpop.f32.mrb[25].mxu0  ;;  %v1615_v28 = vpop.f32.mrb[25].mxu1  ;;  %v1501_v20 = vadd.f32 %v1500_v11, %v4672_v43  ;;  %v1614_v30 = vadd.f32 %v1613_v51, %v4675_v33 }
 0x2f2   : > { %v1504_v2 = vpop.f32.mrb[26].mxu0  ;;  %v1617_v46 = vpop.f32.mrb[26].mxu1  ;;  %v1503_v61 = vadd.f32 %v1502_v10, %v4679_v54  ;;  %v1616_v21 = vadd.f32 %v1615_v28, %v4682_v27 }
 0x2f3   : > { %v1505_v14 = vadd.f32 %v1504_v2, %v4672_v43  ;;  %v1618_v7 = vadd.f32 %v1617_v46, %v4675_v33  ;;  %v1506_v31 = vpop.f32.mrb[27].mxu0  ;;  %v1619_v19 = vpop.f32.mrb[27].mxu1 }
 0x2f4   : > { %v1507_v35 = vadd.f32 %v1506_v31, %v4679_v54  ;;  %v1620_v36 = vadd.f32 %v1619_v19, %v4682_v27 }
 0x2f5   : > { %v1781_v47 = vpack.c.bf16 %v1505_v14, %v1501_v20  ;;  %v1783_v38 = vpack.c.bf16 %v1618_v7, %v1614_v30 }
 0x2f6   : > { %v1782_v5 = vpack.c.bf16 %v1507_v35, %v1503_v61  ;;  %v1784_v60 = vpack.c.bf16 %v1620_v36, %v1616_v21 }
 0x2f7   : > { %1829 = vst [vmem:[#allocation2 + $0x120] sm:$0xff] %v1781_v47  ;;  %1831 = vst [vmem:[#allocation2 + $0x130] sm:$0xff] %v1783_v38 }
 0x2f8   : > { %1830 = vst [vmem:[#allocation2 + $0x128] sm:$0xff] %v1782_v5  ;;  %1832 = vst [vmem:[#allocation2 + $0x138] sm:$0xff] %v1784_v60  ;;  %v1510_v9 = vpop.f32.mrb[28].mxu0  ;;  %v1623_v62 = vpop.f32.mrb[28].mxu1 }
 0x2f9   : > { %v1512_v26 = vpop.f32.mrb[29].mxu0  ;;  %v1625_v0 = vpop.f32.mrb[29].mxu1  ;;  %v1511_v42 = vadd.f32 %v1510_v9, %v4672_v43  ;;  %v1624_v16 = vadd.f32 %v1623_v62, %v4675_v33 }
 0x2fa   : > { %v1514_v24 = vpop.f32.mrb[30].mxu0  ;;  %v1627_v17 = vpop.f32.mrb[30].mxu1  ;;  %v1513_v55 = vadd.f32 %v1512_v26, %v4679_v54  ;;  %v1626_v58 = vadd.f32 %v1625_v0, %v4682_v27 }
 0x2fb   : > { %v1515_v41 = vadd.f32 %v1514_v24, %v4672_v43  ;;  %v1628_v6 = vadd.f32 %v1627_v17, %v4675_v33  ;;  %v1516_v59 = vpop.f32.mrb[31].mxu0  ;;  %v1629_v52 = vpop.f32.mrb[31].mxu1  ;;  %v4751_v43 = vrot.slane %v4667_v39, %v914_v3 }
 0x2fc   : > { %v1517_v13 = vadd.f32 %v1516_v59, %v4679_v54  ;;  %v1630_v44 = vadd.f32 %v1629_v52, %v4682_v27 }
 0x2fd   : > { %v1787_v49 = vpack.c.bf16 %v1515_v41, %v1511_v42  ;;  %v1789_v12 = vpack.c.bf16 %v1628_v6, %v1624_v16 }
 0x2fe   : > { %v1788_v53 = vpack.c.bf16 %v1517_v13, %v1513_v55  ;;  %v1790_v18 = vpack.c.bf16 %v1630_v44, %v1626_v58 }
 0x2ff   : > { %1835 = vst [vmem:[#allocation2 + $0x150] sm:$0xff] %v1787_v49  ;;  %1837 = vst [vmem:[#allocation2 + $0x160] sm:$0xff] %v1789_v12 }
 0x300   : > { %1836 = vst [vmem:[#allocation2 + $0x158] sm:$0xff] %v1788_v53  ;;  %1838 = vst [vmem:[#allocation2 + $0x168] sm:$0xff] %v1790_v18  ;;  %v1666_v33 = vpop.f32.mrb[32].mxu0  ;;  %v1706_v15 = vpop.f32.mrb[32].mxu1 }
 0x301   : > { %v1668_v45 = vpop.f32.mrb[33].mxu0  ;;  %v1708_v54 = vpop.f32.mrb[33].mxu1  ;;  %v1667_v23 = vadd.f32 %v1666_v33, %v4751_v43  ;;  %v1707_v56 = vadd.f32 %v1706_v15, %v4751_v43 }
 0x302   : > { %v1670_v48 = vpop.f32.mrb[34].mxu0  ;;  %v1710_v27 = vpop.f32.mrb[34].mxu1  ;;  %v1669_v34 = vadd.f32 %v1668_v45, %v4754_v8  ;;  %v1709_v40 = vadd.f32 %v1708_v54, %v4754_v8 }
 0x303   : > { %v1671_v22 = vadd.f32 %v1670_v48, %v4751_v43  ;;  %v1711_v32 = vadd.f32 %v1710_v27, %v4751_v43  ;;  %v1672_v63 = vpop.f32.mrb[35].mxu0  ;;  %v1712_v29 = vpop.f32.mrb[35].mxu1 }
 0x304   : > { %v1673_v39 = vadd.f32 %v1672_v63, %v4754_v8  ;;  %v1713_v37 = vadd.f32 %v1712_v29, %v4754_v8 }
 0x305   : > { %v1749_v25 = vpack.c.bf16 %v1671_v22, %v1667_v23  ;;  %v1773_v57 = vpack.c.bf16 %v1711_v32, %v1707_v56 }
 0x306   : > { %v1750_v1 = vpack.c.bf16 %v1673_v39, %v1669_v34  ;;  %v1774_v4 = vpack.c.bf16 %v1713_v37, %v1709_v40 }
 0x307   : > { %1797 = vst [vmem:[#allocation2 + $0x20] sm:$0xff] %v1749_v25  ;;  %1821 = vst [vmem:[#allocation2 + $0xe0] sm:$0xff] %v1773_v57 }
 0x308   : > { %1798 = vst [vmem:[#allocation2 + $0x28] sm:$0xff] %v1750_v1  ;;  %1822 = vst [vmem:[#allocation2 + $0xe8] sm:$0xff] %v1774_v4  ;;  %v1676_v11 = vpop.f32.mrb[36].mxu0  ;;  %v1716_v51 = vpop.f32.mrb[36].mxu1 }
 0x309   : > { %v1678_v10 = vpop.f32.mrb[37].mxu0  ;;  %v1718_v28 = vpop.f32.mrb[37].mxu1  ;;  %v1677_v20 = vadd.f32 %v1676_v11, %v4751_v43  ;;  %v1717_v30 = vadd.f32 %v1716_v51, %v4751_v43 }
 0x30a   : > { %v1680_v2 = vpop.f32.mrb[38].mxu0  ;;  %v1720_v46 = vpop.f32.mrb[38].mxu1  ;;  %v1679_v61 = vadd.f32 %v1678_v10, %v4754_v8  ;;  %v1719_v21 = vadd.f32 %v1718_v28, %v4754_v8 }
 0x30b   : > { %v1681_v14 = vadd.f32 %v1680_v2, %v4751_v43  ;;  %v1721_v7 = vadd.f32 %v1720_v46, %v4751_v43  ;;  %v1682_v31 = vpop.f32.mrb[39].mxu0  ;;  %v1722_v19 = vpop.f32.mrb[39].mxu1 }
 0x30c   : > { %v1683_v35 = vadd.f32 %v1682_v31, %v4754_v8  ;;  %v1723_v36 = vadd.f32 %v1722_v19, %v4754_v8 }
 0x30d   : > { %v1755_v47 = vpack.c.bf16 %v1681_v14, %v1677_v20  ;;  %v1779_v38 = vpack.c.bf16 %v1721_v7, %v1717_v30 }
 0x30e   : > { %v1756_v5 = vpack.c.bf16 %v1683_v35, %v1679_v61  ;;  %v1780_v60 = vpack.c.bf16 %v1723_v36, %v1719_v21 }
 0x30f   : > { %1803 = vst [vmem:[#allocation2 + $0x50] sm:$0xff] %v1755_v47  ;;  %1827 = vst [vmem:[#allocation2 + $0x110] sm:$0xff] %v1779_v38 }
 0x310   : > { %1804 = vst [vmem:[#allocation2 + $0x58] sm:$0xff] %v1756_v5  ;;  %1828 = vst [vmem:[#allocation2 + $0x118] sm:$0xff] %v1780_v60  ;;  %v1686_v9 = vpop.f32.mrb[40].mxu0  ;;  %v1726_v62 = vpop.f32.mrb[40].mxu1 }
 0x311   : > { %v1688_v26 = vpop.f32.mrb[41].mxu0  ;;  %v1728_v0 = vpop.f32.mrb[41].mxu1  ;;  %v1687_v3 = vadd.f32 %v1686_v9, %v4751_v43  ;;  %v1727_v50 = vadd.f32 %v1726_v62, %v4751_v43 }
 0x312   : > { %v1690_v24 = vpop.f32.mrb[42].mxu0  ;;  %v1730_v17 = vpop.f32.mrb[42].mxu1  ;;  %v1689_v59 = vadd.f32 %v1688_v26, %v4754_v8  ;;  %v1729_v52 = vadd.f32 %v1728_v0, %v4754_v8 }
 0x313   : > { %v1691_v42 = vadd.f32 %v1690_v24, %v4751_v43  ;;  %v1731_v16 = vadd.f32 %v1730_v17, %v4751_v43  ;;  %v1692_v41 = vpop.f32.mrb[43].mxu0  ;;  %v1732_v6 = vpop.f32.mrb[43].mxu1 }
 0x314   : > { %v1693_v55 = vadd.f32 %v1692_v41, %v4754_v8  ;;  %v1733_v58 = vadd.f32 %v1732_v6, %v4754_v8 }
 0x315   : > { %v1761_v13 = vpack.c.bf16 %v1691_v42, %v1687_v3  ;;  %v1785_v44 = vpack.c.bf16 %v1731_v16, %v1727_v50 }
 0x316   : > { %v1762_v49 = vpack.c.bf16 %v1693_v55, %v1689_v59  ;;  %v1786_v12 = vpack.c.bf16 %v1733_v58, %v1729_v52 }
 0x317   : > { %1809 = vst [vmem:[#allocation2 + $0x80] sm:$0xff] %v1761_v13  ;;  %1833 = vst [vmem:[#allocation2 + $0x140] sm:$0xff] %v1785_v44 }
 0x318   : > { %1810 = vst [vmem:[#allocation2 + $0x88] sm:$0xff] %v1762_v49  ;;  %1834 = vst [vmem:[#allocation2 + $0x148] sm:$0xff] %v1786_v12  ;;  %v1696_v53 = vpop.f32.mrb[44].mxu0  ;;  %v1736_v18 = vpop.f32.mrb[44].mxu1 }
 0x319   : > { %v1698_v33 = vpop.f32.mrb[45].mxu0  ;;  %v1738_v15 = vpop.f32.mrb[45].mxu1  ;;  %v1697_v48 = vadd.f32 %v1696_v53, %v4751_v43  ;;  %v1737_v27 = vadd.f32 %v1736_v18, %v4751_v43 }
 0x31a   : > { %v1700_v45 = vpop.f32.mrb[46].mxu0  ;;  %v1740_v54 = vpop.f32.mrb[46].mxu1  ;;  %v1699_v63 = vadd.f32 %v1698_v33, %v4754_v8  ;;  %v1739_v29 = vadd.f32 %v1738_v15, %v4754_v8 }
 0x31b   : > { %v1701_v23 = vadd.f32 %v1700_v45, %v4751_v43  ;;  %v1741_v56 = vadd.f32 %v1740_v54, %v4751_v43  ;;  %v1702_v22 = vpop.f32.mrb[47].mxu0  ;;  %v1742_v32 = vpop.f32.mrb[47].mxu1 }
 0x31c   : > { %v1703_v34 = vadd.f32 %v1702_v22, %v4754_v8  ;;  %v1743_v40 = vadd.f32 %v1742_v32, %v4754_v8 }
 0x31d   : > { %v1767_v39 = vpack.c.bf16 %v1701_v23, %v1697_v48  ;;  %v1791_v37 = vpack.c.bf16 %v1741_v56, %v1737_v27 }
 0x31e   : > { %v1768_v25 = vpack.c.bf16 %v1703_v34, %v1699_v63  ;;  %v1792_v57 = vpack.c.bf16 %v1743_v40, %v1739_v29 }
 0x31f   : > { %1815 = vst [vmem:[#allocation2 + $0xb0] sm:$0xff] %v1767_v39  ;;  %1839 = vst [vmem:[#allocation2 + $0x170] sm:$0xff] %v1791_v37 }
 0x320   : > { %1816 = vst [vmem:[#allocation2 + $0xb8] sm:$0xff] %v1768_v25  ;;  %1840 = vst [vmem:[#allocation2 + $0x178] sm:$0xff] %v1792_v57 }
 0x321 PF: > { %s4789_s18 = sshll.u32 %s3817_s30, 7  ;;  %v3000_v61 = vld [vmem:[%s4174_s16 + $0x8] sm:$0xff]   ;;  %v2897_v21 = vld [vmem:[%s4174_s16] sm:$0xff]   ;;  %v3001_v0 = vld [vmem:[%s4174_s16 + $0x10] sm:$0xff]   ;;  %s5224_s19 = sld [smem:[#allocation17_spill]] }
 0x322   : > { %s1842_s7 = sadd.s32 256, %s4789_s18  ;;  %s1844_s8 = sshra.s32 %s4789_s18, 7  ;;  %v2902_v35 = vunpack.c.l.bf16 %v3000_v61  ;;  %v2898_v36 = vunpack.c.l.bf16 %v2897_v21  ;;  %v2903_v38 = vunpack.c.h.bf16 %v3000_v61  ;;  %v2899_v9 = vunpack.c.h.bf16 %v2897_v21  ;;  %v3002_v55 = vld [vmem:[%s4174_s16 + $0x18] sm:$0xff]   ;;  %v3003_v33 = vld [vmem:[%s4174_s16 + $0x20] sm:$0xff]   ;;  %v3004_v29 = vld [vmem:[%s4174_s16 + $0x28] sm:$0xff]  }
 0x323   : > { %s1856_s0 = sshra.s32 %s1842_s7, 7  ;;  %s2853_s27 = sshll.u32 %s1844_s8, 3  ;;  %v2906_v52 = vunpack.c.l.bf16 %v3001_v0  ;;  %v2907_v58 = vunpack.c.h.bf16 %v3001_v0  ;;  %v2910_v44 = vunpack.c.l.bf16 %v3002_v55  ;;  %v2911_v48 = vunpack.c.h.bf16 %v3002_v55 }
 0x324   : > { %s2854_s21 = sshll.u32 %s1856_s0, 3  ;;  %s4793_s14 = scalar_lea.vmem [#allocation2], %s2853_s27  ;;  %v2027_v47 = vmul.f32 -1e+09, %v2902_v35  ;;  %v2025_v60 = vmul.f32 -1e+09, %v2898_v36  ;;  %v2914_v63 = vunpack.c.l.bf16 %v3003_v33  ;;  %v2915_v37 = vunpack.c.h.bf16 %v3003_v33 }
 0x325   : > { %s1859_s22 = scalar_lea.vmem [#allocation2], %s2854_s21  ;;  %v2028_v16 = vmul.f32 -1e+09, %v2903_v38  ;;  %v2026_v59 = vmul.f32 -1e+09, %v2899_v9  ;;  %v2918_v25 = vunpack.c.l.bf16 %v3004_v29  ;;  %s2593_s26 = sshll.u32 %s4185_s17, 4  ;;  %s5100_s26 = int_to_ptr.vmem [resolvable:$true] %s2593_s26 }
 0x326   : > { %v2029_v53 = vmul.f32 -1e+09, %v2906_v52  ;;  %v2030_v54 = vmul.f32 -1e+09, %v2907_v58  ;;  %v2031_v23 = vmul.f32 -1e+09, %v2910_v44 }
 0x327   : > { %v1848_v43 = vld [vmem:[%s4793_s14] sm:$0xff]  ;;  %v1861_v1 = vld [vmem:[%s1859_s22 + $0x30] sm:$0xff]  ;;  %v2032_v39 = vmul.f32 -1e+09, %v2911_v48  ;;  %s2873_s5 = sshll.u32 %s5224_s19, 5  ;;  %s5225_s7 = sld [smem:[#allocation27_spill]] }
 0x328   : > { %v1860_v8 = vld [vmem:[%s1859_s22] sm:$0xff]  ;;  %3069 = vmatprep.mubr.bf16.mxu0 %v1848_v43  ;;  %v1863_v11 = vld [vmem:[%s1859_s22 + $0x90] sm:$0xff]  ;;  %s2590_s9 = sadd.s32 %s3817_s30, %s2873_s5  ;;  %s5106_s30 = scalar_lea.sflag [#allocation5], %s397_s12 }
 0x329   : > { %3053 = vmatprep.subr.bf16.mxu0 %v1860_v8  ;;  %v1862_v4 = vld [vmem:[%s1859_s22 + $0x60] sm:$0xff]  ;;  %v1865_v10 = vld [vmem:[%s1859_s22 + $0xf0] sm:$0xff]  ;;  %s2874_s15 = sshll.u32 %s2590_s9, 6  ;;  %s3703_s0 = scalar_lea.vmem %s5100_s26, 1024 }
 0x32a   : > { %3054 = vmatpush3.bf16.xpose.msra.mxu0 %v1860_v8  ;;  %v1864_v51 = vld [vmem:[%s1859_s22 + $0xc0] sm:$0xff]  ;;  %v1867_v2 = vld [vmem:[%s1859_s22 + $0x150] sm:$0xff]  ;;  %v2033_v8 = vmul.f32 -1e+09, %v2914_v63  ;;  %p3704_p7 = scmp.ne.s32.totalorder %s5100_s26, %s3703_s0  ;;  %p5226_p9 = scmp.ne.s32.totalorder %s5210_s23, 0 }
 0x32b   : > { %3055 = vmatprep.subr.bf16.mxu0 %v1861_v1  ;;  %v1866_v28 = vld [vmem:[%s1859_s22 + $0x120] sm:$0xff]  ;;  %v1849_v46 = vld [vmem:[%s4793_s14 + $0x30] sm:$0xff]  ;;  %s3845_s27 = smov [#allocation10]  }
 0x32c   : > { %v1850_v20 = vld [vmem:[%s4793_s14 + $0x60] sm:$0xff]  ;;  %v1851_v30 = vld [vmem:[%s4793_s14 + $0x90] sm:$0xff]  ;;  %p3705_p12 = pnand %p3704_p7, %p5226_p9  ;;  %s3707_s21 = sshll.u32 %s3845_s27, 4  ;;  %s3708_s21 = int_to_ptr.vmem [resolvable:$false] %s3707_s21 }
 0x32d   : > { %v1852_v14 = vld [vmem:[%s4793_s14 + $0xc0] sm:$0xff]  ;;  %v1853_v7 = vld [vmem:[%s4793_s14 + $0xf0] sm:$0xff]  ;;  %s5098_s8 = scalar_lea.hbm %s5225_s7, %s2874_s15  ;;  %p3710_p5 = scmp.lt.s32.totalorder %s5100_s26, %s3708_s21 }
 0x32e   : > { %v1854_v31 = vld [vmem:[%s4793_s14 + $0x120] sm:$0xff]  ;;  %v1855_v19 = vld [vmem:[%s4793_s14 + $0x150] sm:$0xff]  ;;  %p3706_p2 = pneg %p3705_p12  ;;  %s3709_s14 = scalar_lea.vmem %s3708_s21, 2048 }
 0x32f   : > { %p3711_p4 = scmp.lt.s32.totalorder %s3709_s14, %s3703_s0 }
 0x331   : > { %p3712_p6 = por %p3711_p4, %p3710_p5 }
 0x332   : > { %3056 = vmatpush3.bf16.xpose.msra.mxu0 %v1861_v1 }
 0x333   : > { %3057 = vmatprep.subr.bf16.mxu0 %v1862_v4  ;;  %p3713_p10 = pnand %p3712_p6, %p3706_p2 }
 0x33a   : > { %3058 = vmatpush3.bf16.xpose.msra.mxu0 %v1862_v4  ;;  %v3005_v4 = vld [vmem:[%s4174_s16 + $0x30] sm:$0xff]  }
 0x33b   : > { %3059 = vmatprep.subr.bf16.mxu0 %v1863_v11  ;;  %v2923_v36 = vunpack.c.h.bf16 %v3005_v4 }
 0x342   : > { %3060 = vmatpush3.bf16.xpose.msra.mxu0 %v1863_v11 }
 0x343   : > { %3061 = vmatprep.subr.bf16.mxu0 %v1864_v51 }
 0x34a   : > { %3062 = vmatpush3.bf16.xpose.msra.mxu0 %v1864_v51 }
 0x34b   : > { %3063 = vmatprep.subr.bf16.mxu0 %v1865_v10 }
 0x352   : > { %3064 = vmatpush3.bf16.xpose.msra.mxu0 %v1865_v10 }
 0x353   : > { %3065 = vmatprep.subr.bf16.mxu0 %v1866_v28 }
 0x35a   : > { %3066 = vmatpush3.bf16.xpose.msra.mxu0 %v1866_v28  ;;  %v2034_v28 = vmul.f32 -1e+09, %v2915_v37 }
 0x35b   : > { %3067 = vmatprep.subr.bf16.mxu0 %v1867_v2 }
 0x362   : > { %3068 = vmatpush3.bf16.xpose.msra.mxu0 %v1867_v2  ;;  %v2919_v2 = vunpack.c.h.bf16 %v3004_v29 }
 0x364   : > { %v2036_v35 = vmul.f32 -1e+09, %v2919_v2 }
 0x369   : > { %3070 = vmatmul.mubr.bf16.vlgmr.msra.gmra.mrb[0].mxu0 %v1849_v46 }
 0x36a   : > { %3073 = vmatprep.mubr.bf16.mxu0 %v1850_v20  ;;  %v2035_v20 = vmul.f32 -1e+09, %v2918_v25 }
 0x371   : > { %3074 = vmatmul.mubr.bf16.gmra.mrb[4].mxu0 %v1851_v30 }
 0x372   : > { %3077 = vmatprep.mubr.bf16.mxu0 %v1852_v14 }
 0x379   : > { %3078 = vmatmul.mubr.bf16.gmra.mrb[8].mxu0 %v1853_v7 }
 0x37a   : > { %3081 = vmatprep.mubr.bf16.mxu0 %v1854_v31  ;;  %v2922_v31 = vunpack.c.l.bf16 %v3005_v4 }
 0x381   : > { %3082 = vmatmul.mubr.bf16.gmra.mrb[12].mxu0 %v1855_v19  ;;  %v3006_v19 = vld [vmem:[%s4174_s16 + $0x38] sm:$0xff]   ;;  %s1843_s16 = sadd.s32 512, %s4789_s18 }
 0x382   : > { %s1868_s13 = sshra.s32 %s1843_s16, 7 }
 0x43c   : > { %v3071_v5 = vpop.f32.mrb[0].mxu0 }
 0x43d   : > { %v1979_v62 = vmul.f32 0.088388346, %v3071_v5  ;;  %v1914_v26 = vpop.f32.mrb[1].mxu0  ;;  %v2037_v5 = vmul.f32 -1e+09, %v2922_v31 }
 0x43e   : > { %v1977_v24 = vmul.f32 0.088388346, %v1914_v26  ;;  %v3072_v17 = vpop.f32.mrb[2].mxu0 }
 0x43f   : > { %v1980_v3 = vmul.f32 0.088388346, %v3072_v17  ;;  %v1917_v50 = vpop.f32.mrb[3].mxu0  ;;  %v4806_v42 = vadd.f32 %v2027_v47, %v1979_v62  ;;  %v2927_v17 = vunpack.c.h.bf16 %v3006_v19 }
 0x440   : > { %v1978_v41 = vmul.f32 0.088388346, %v1917_v50  ;;  %v4808_v6 = vadd.f32 %v2025_v60, %v1977_v24  ;;  %v2926_v60 = vunpack.c.l.bf16 %v3006_v19  ;;  %v2038_v24 = vmul.f32 -1e+09, %v2923_v36 }
 0x441   : > { %2061 = vmax.xlane.f32.xlu1 %v4806_v42  ;;  %v4813_v13 = vadd.f32 %v2028_v16, %v1980_v3  ;;  %v2040_v58 = vmul.f32 -1e+09, %v2927_v17 }
 0x442   : > { %2057 = vmax.xlane.f32.xlu0 %v4808_v6  ;;  %v4815_v12 = vadd.f32 %v2026_v59, %v1978_v41  ;;  %v2039_v59 = vmul.f32 -1e+09, %v2926_v60 }
 0x444   : > { %v3075_v49 = vpop.f32.mrb[4].mxu0 }
 0x445   : > { %2063 = vmax.xlane.f32.xlu1 %v4813_v13  ;;  %v1930_v18 = vpop.f32.mrb[5].mxu0  ;;  %v1983_v56 = vmul.f32 0.088388346, %v3075_v49 }
 0x446   : > { %v1981_v15 = vmul.f32 0.088388346, %v1930_v18  ;;  %2059 = vmax.xlane.f32.xlu0 %v4815_v12  ;;  %v3076_v45 = vpop.f32.mrb[6].mxu0 }
 0x447   : > { %v1933_v27 = vpop.f32.mrb[7].mxu0  ;;  %v1984_v34 = vmul.f32 0.088388346, %v3076_v45  ;;  %v4827_v43 = vadd.f32 %v2031_v23, %v1983_v56 }
 0x448   : > { %v1982_v22 = vmul.f32 0.088388346, %v1933_v27  ;;  %v4820_v32 = vadd.f32 %v2029_v53, %v1981_v15 }
 0x449   : > { %v4831_v10 = vadd.f32 %v2032_v39, %v1984_v34 }
 0x44a   : > { %2065 = vmax.xlane.f32.xlu0 %v4820_v32  ;;  %v4824_v40 = vadd.f32 %v2030_v54, %v1982_v22 }
 0x44c   : > { %2067 = vmax.xlane.f32.xlu1 %v4824_v40  ;;  %v3079_v57 = vpop.f32.mrb[8].mxu0 }
 0x44d   : > { %v1946_v1 = vpop.f32.mrb[9].mxu0  ;;  %v1987_v30 = vmul.f32 0.088388346, %v3079_v57 }
 0x44e   : > { %v1985_v11 = vmul.f32 0.088388346, %v1946_v1  ;;  %2069 = vmax.xlane.f32.xlu0 %v4827_v43  ;;  %v3080_v51 = vpop.f32.mrb[10].mxu0 }
 0x44f   : > { %v1949_v46 = vpop.f32.mrb[11].mxu0  ;;  %v1988_v61 = vmul.f32 0.088388346, %v3080_v51  ;;  %v4841_v38 = vadd.f32 %v2035_v20, %v1987_v30 }
 0x450   : > { %v1986_v14 = vmul.f32 0.088388346, %v1949_v46  ;;  %2071 = vmax.xlane.f32.xlu1 %v4831_v10  ;;  %v4834_v7 = vadd.f32 %v2033_v8, %v1985_v11 }
 0x451   : > { %v4844_v0 = vadd.f32 %v2036_v35, %v1988_v61 }
 0x452   : > { %2073 = vmax.xlane.f32.xlu0 %v4834_v7  ;;  %v4838_v21 = vadd.f32 %v2034_v28, %v1986_v14 }
 0x454   : > { %2075 = vmax.xlane.f32.xlu1 %v4838_v21  ;;  %v3083_v47 = vpop.f32.mrb[12].mxu0 }
 0x455   : > { %v1962_v9 = vpop.f32.mrb[13].mxu0  ;;  %v1991_v50 = vmul.f32 0.088388346, %v3083_v47 }
 0x456   : > { %v1989_v62 = vmul.f32 0.088388346, %v1962_v9  ;;  %2077 = vmax.xlane.f32.xlu0 %v4841_v38  ;;  %v3084_v26 = vpop.f32.mrb[14].mxu0 }
 0x457   : > { %v1965_v3 = vpop.f32.mrb[15].mxu0  ;;  %v1992_v52 = vmul.f32 0.088388346, %v3084_v26  ;;  %v4853_v44 = vadd.f32 %v2039_v59, %v1991_v50 }
 0x458   : > { %v1990_v16 = vmul.f32 0.088388346, %v1965_v3  ;;  %2079 = vmax.xlane.f32.xlu1 %v4844_v0  ;;  %v4847_v41 = vadd.f32 %v2037_v5, %v1989_v62 }
 0x459   : > { %v4856_v49 = vadd.f32 %v2040_v58, %v1992_v52 }
 0x45a   : > { %2081 = vmax.xlane.f32.xlu0 %v4847_v41  ;;  %v4850_v55 = vadd.f32 %v2038_v24, %v1990_v16 }
 0x45c   : > { %2083 = vmax.xlane.f32.xlu1 %v4850_v55 }
 0x45e   : > { %2085 = vmax.xlane.f32.xlu0 %v4853_v44 }
 0x460   : > { %2087 = vmax.xlane.f32.xlu1 %v4856_v49 }
 0x4ce   : > { %v2062_v53 = vpop.xlane.xlu1 %2061 }
 0x4cf   : > { %v2091_v18 = vsub.f32 %v4806_v42, %v2062_v53  ;;  %v2058_v33 = vpop.xlane.xlu0 %2057 }
 0x4d0   : > { %v2089_v15 = vsub.f32 %v4808_v6, %v2058_v33 }
 0x4d1   : > { %v2109_v48 = vmul.f32 1.442695, %v2091_v18 }
 0x4d2   : > { %v2105_v45 = vmul.f32 1.442695, %v2089_v15  ;;  %v2064_v54 = vpop.xlane.xlu1 %2063  ;;  %v2929_v15 = vld [vmem:[%s4183_s4] sm:$0xff]  }
 0x4d3   : > { %v2092_v27 = vsub.f32 %v4813_v13, %v2064_v54  ;;  %v2060_v23 = vpop.xlane.xlu0 %2059 }
 0x4d4   : > { %3457 = vpow2.f32 %v2105_v45  ;;  %v2090_v56 = vsub.f32 %v4815_v12, %v2060_v23  ;;  %v3007_v23 = vld [vmem:[%s4183_s4 + $0x8] sm:$0xff]  }
 0x4d5   : > { %3459 = vpow2.f32 %v2109_v48  ;;  %v2111_v63 = vmul.f32 1.442695, %v2092_v27  ;;  %v2930_v48 = vunpack.c.l.bf16 %v2929_v15 }
 0x4d6   : > { %v2107_v22 = vmul.f32 1.442695, %v2090_v56 }
 0x4d7   : > { %v2066_v29 = vpop.xlane.xlu0 %2065 }
 0x4d8   : > { %3461 = vpow2.f32 %v2107_v22  ;;  %v2093_v34 = vsub.f32 %v4820_v32, %v2066_v29 }
 0x4d9   : > { %v2068_v42 = vpop.xlane.xlu1 %2067  ;;  %3463 = vpow2.f32 %v2111_v63 }
 0x4da   : > { %v2113_v39 = vmul.f32 1.442695, %v2093_v34  ;;  %v2094_v6 = vsub.f32 %v4824_v40, %v2068_v42  ;;  %v2934_v34 = vunpack.c.l.bf16 %v3007_v23 }
 0x4db   : > { %v2070_v37 = vpop.xlane.xlu0 %2069 }
 0x4dc   : > { %3465 = vpow2.f32 %v2113_v39  ;;  %v2115_v25 = vmul.f32 1.442695, %v2094_v6  ;;  %v2095_v13 = vsub.f32 %v4827_v43, %v2070_v37  ;;  %v2931_v39 = vunpack.c.h.bf16 %v2929_v15  ;;  %v3008_v6 = vld [vmem:[%s4183_s4 + $0x10] sm:$0xff]  }
 0x4dd   : > { %v2072_v57 = vpop.xlane.xlu1 %2071 }
 0x4de   : > { %v4866_v8 = vpop.eup %3457  ;;  %v2117_v12 = vmul.f32 1.442695, %v2095_v13  ;;  %v2096_v1 = vsub.f32 %v4831_v10, %v2072_v57  ;;  %3467 = vpow2.f32 %v2115_v25 }
 0x4df   : > { %v2074_v4 = vpop.xlane.xlu0 %2073  ;;  %2137 = vadd.xlane.f32.xlu0 %v4866_v8  ;;  %v4871_v11 = vpop.eup %3459 }
 0x4e0   : > { %3469 = vpow2.f32 %v2117_v12  ;;  %v2119_v32 = vmul.f32 1.442695, %v2096_v1  ;;  %v2097_v40 = vsub.f32 %v4834_v7, %v2074_v4  ;;  %v2938_v1 = vunpack.c.l.bf16 %v3008_v6 }
 0x4e1   : > { %v2076_v51 = vpop.xlane.xlu1 %2075 }
 0x4e2   : > { %v4873_v28 = vpop.eup %3461  ;;  %v2121_v43 = vmul.f32 1.442695, %v2097_v40  ;;  %v2098_v2 = vsub.f32 %v4838_v21, %v2076_v51  ;;  %3471 = vpow2.f32 %v2119_v32  ;;  %v2935_v40 = vunpack.c.h.bf16 %v3007_v23  ;;  %v3009_v51 = vld [vmem:[%s4183_s4 + $0x18] sm:$0xff]  }
 0x4e3   : > { %v2078_v46 = vpop.xlane.xlu0 %2077  ;;  %2141 = vadd.xlane.f32.xlu0 %v4871_v11  ;;  %2139 = vadd.xlane.f32.xlu1 %v4873_v28  ;;  %v4879_v30 = vpop.eup %3463 }
 0x4e4   : > { %3473 = vpow2.f32 %v2121_v43  ;;  %v2123_v10 = vmul.f32 1.442695, %v2098_v2  ;;  %v2099_v20 = vsub.f32 %v4841_v38, %v2078_v46 }
 0x4e5   : > { %v2080_v14 = vpop.xlane.xlu1 %2079 }
 0x4e6   : > { %v4881_v7 = vpop.eup %3465  ;;  %v2125_v31 = vmul.f32 1.442695, %v2099_v20  ;;  %v2100_v19 = vsub.f32 %v4844_v0, %v2080_v14  ;;  %3475 = vpow2.f32 %v2123_v10  ;;  %v2942_v20 = vunpack.c.l.bf16 %v3009_v51 }
 0x4e7   : > { %2145 = vadd.xlane.f32.xlu0 %v4881_v7  ;;  %v2082_v61 = vpop.xlane.xlu0 %2081  ;;  %2143 = vadd.xlane.f32.xlu1 %v4879_v30 }
 0x4e8   : > { %3477 = vpow2.f32 %v2125_v31  ;;  %v2127_v21 = vmul.f32 1.442695, %v2100_v19  ;;  %v2101_v35 = vsub.f32 %v4847_v41, %v2082_v61  ;;  %v4887_v36 = vpop.eup %3467  ;;  %v2939_v19 = vunpack.c.h.bf16 %v3008_v6  ;;  %v3010_v61 = vld [vmem:[%s4183_s4 + $0x20] sm:$0xff]  }
 0x4e9   : > { %v2084_v47 = vpop.xlane.xlu1 %2083 }
 0x4ea   : > { %v4889_v38 = vpop.eup %3469  ;;  %v2129_v5 = vmul.f32 1.442695, %v2101_v35  ;;  %v2102_v60 = vsub.f32 %v4850_v55, %v2084_v47  ;;  %3479 = vpow2.f32 %v2127_v21 }
 0x4eb   : > { %2149 = vadd.xlane.f32.xlu0 %v4889_v38  ;;  %v2086_v9 = vpop.xlane.xlu0 %2085  ;;  %2147 = vadd.xlane.f32.xlu1 %v4887_v36 }
 0x4ec   : > { %3481 = vpow2.f32 %v2129_v5  ;;  %v2131_v62 = vmul.f32 1.442695, %v2102_v60  ;;  %v2103_v26 = vsub.f32 %v4853_v44, %v2086_v9  ;;  %v4895_v0 = vpop.eup %3471  ;;  %v2946_v60 = vunpack.c.l.bf16 %v3010_v61 }
 0x4ed   : > { %v2088_v24 = vpop.xlane.xlu1 %2087 }
 0x4ee   : > { %v4897_v17 = vpop.eup %3473  ;;  %v2133_v3 = vmul.f32 1.442695, %v2103_v26  ;;  %v2104_v50 = vsub.f32 %v4856_v49, %v2088_v24  ;;  %3483 = vpow2.f32 %v2131_v62  ;;  %v2943_v26 = vunpack.c.h.bf16 %v3009_v51  ;;  %v3011_v24 = vld [vmem:[%s4183_s4 + $0x28] sm:$0xff]  }
 0x4ef   : > { %2153 = vadd.xlane.f32.xlu0 %v4897_v17  ;;  %2151 = vadd.xlane.f32.xlu1 %v4895_v0 }
 0x4f0   : > { %3485 = vpow2.f32 %v2133_v3  ;;  %v2135_v16 = vmul.f32 1.442695, %v2104_v50  ;;  %v4902_v41 = vpop.eup %3475 }
 0x4f2   : > { %v4904_v59 = vpop.eup %3477  ;;  %3487 = vpow2.f32 %v2135_v16 }
 0x4f3   : > { %2157 = vadd.xlane.f32.xlu0 %v4904_v59  ;;  %2155 = vadd.xlane.f32.xlu1 %v4902_v41 }
 0x4f4   : > { %v4908_v52 = vpop.eup %3479 }
 0x4f6   : > { %v4910_v55 = vpop.eup %3481 }
 0x4f7   : > { %2161 = vadd.xlane.f32.xlu0 %v4910_v55  ;;  %2159 = vadd.xlane.f32.xlu1 %v4908_v52 }
 0x4f8   : > { %v4914_v58 = vpop.eup %3483 }
 0x4fa   : > { %v4916_v44 = vpop.eup %3485 }
 0x4fb   : > { %2165 = vadd.xlane.f32.xlu0 %v4916_v44  ;;  %2163 = vadd.xlane.f32.xlu1 %v4914_v58 }
 0x4fc   : > { %v4920_v49 = vpop.eup %3487 }
 0x4ff   : > { %2167 = vadd.xlane.f32.xlu1 %v4920_v49 }
 0x56c   : > { %v2138_v53 = vpop.xlane.xlu0 %2137 }
 0x56d   : > { %3489 = vrcp.f32 %v2138_v53 }
 0x570   : > { %v2142_v18 = vpop.xlane.xlu0 %2141  ;;  %v2140_v33 = vpop.xlane.xlu1 %2139 }
 0x571   : > { %3491 = vrcp.f32 %v2142_v18  ;;  %v2950_v18 = vunpack.c.l.bf16 %v3011_v24 }
 0x572   : > { %3493 = vrcp.f32 %v2140_v33 }
 0x574   : > { %v2146_v45 = vpop.xlane.xlu0 %2145  ;;  %v2144_v54 = vpop.xlane.xlu1 %2143 }
 0x575   : > { %3495 = vrcp.f32 %v2146_v45  ;;  %v2947_v45 = vunpack.c.h.bf16 %v3010_v61 }
 0x576   : > { %3497 = vrcp.f32 %v2144_v54  ;;  %v3012_v54 = vld [vmem:[%s4183_s4 + $0x30] sm:$0xff]  }
 0x577   : > { %v3490_v27 = vpop.eup %3489 }
 0x578   : > { %v2150_v56 = vpop.xlane.xlu0 %2149  ;;  %v2148_v22 = vpop.xlane.xlu1 %2147  ;;  %v2185_v63 = vmul.f32 %v3490_v27, %v4866_v8 }
 0x579   : > { %3499 = vrcp.f32 %v2150_v56  ;;  %v2954_v56 = vunpack.c.l.bf16 %v3012_v54 }
 0x57a   : > { %3501 = vrcp.f32 %v2148_v22  ;;  %v4926_v29 = vadd.f32 %v2930_v48, %v2185_v63 }
 0x57b   : > { %v3492_v42 = vpop.eup %3491 }
 0x57c   : > { %v3494_v37 = vpop.eup %3493  ;;  %2249 = vmax.xlane.f32.xlu0 %v4926_v29  ;;  %v2154_v25 = vpop.xlane.xlu0 %2153  ;;  %v2187_v57 = vmul.f32 %v3492_v42, %v4871_v11  ;;  %v3013_v42 = vld [vmem:[%s4183_s4 + $0x38] sm:$0xff]   ;;  %s2855_s4 = sshll.u32 %s1868_s13, 3 }
 0x57d   : > { %v2152_v13 = vpop.xlane.xlu1 %2151  ;;  %3503 = vrcp.f32 %v2154_v25  ;;  %v2186_v12 = vmul.f32 %v3494_v37, %v4873_v28  ;;  %s4996_s20 = scalar_lea.vmem [#allocation2], %s2855_s4 }
 0x57e   : > { %3505 = vrcp.f32 %v2152_v13  ;;  %v4932_v8 = vadd.f32 %v2934_v34, %v2187_v57  ;;  %v2951_v34 = vunpack.c.h.bf16 %v3011_v24  ;;  %v2955_v57 = vunpack.c.h.bf16 %v3012_v54 }
 0x57f   : > { %v3496_v4 = vpop.eup %3495  ;;  %v4934_v32 = vadd.f32 %v2931_v39, %v2186_v12 }
 0x580   : > { %v3498_v43 = vpop.eup %3497  ;;  %2253 = vmax.xlane.f32.xlu0 %v4932_v8  ;;  %v2158_v2 = vpop.xlane.xlu0 %2157  ;;  %v2189_v11 = vmul.f32 %v3496_v4, %v4881_v7 }
 0x581   : > { %v2156_v46 = vpop.xlane.xlu1 %2155  ;;  %3507 = vrcp.f32 %v2158_v2  ;;  %2251 = vmax.xlane.f32.xlu1 %v4934_v32  ;;  %v2188_v28 = vmul.f32 %v3498_v43, %v4879_v30 }
 0x582   : > { %3509 = vrcp.f32 %v2156_v46  ;;  %v4941_v10 = vadd.f32 %v2938_v1, %v2189_v11 }
 0x583   : > { %v3500_v14 = vpop.eup %3499  ;;  %v4943_v31 = vadd.f32 %v2935_v40, %v2188_v28 }
 0x584   : > { %v3502_v21 = vpop.eup %3501  ;;  %2257 = vmax.xlane.f32.xlu0 %v4941_v10  ;;  %v2162_v35 = vpop.xlane.xlu0 %2161  ;;  %v2191_v47 = vmul.f32 %v3500_v14, %v4889_v38 }
 0x585   : > { %v2160_v7 = vpop.xlane.xlu1 %2159  ;;  %3511 = vrcp.f32 %v2162_v35  ;;  %2255 = vmax.xlane.f32.xlu1 %v4943_v31  ;;  %v2190_v30 = vmul.f32 %v3502_v21, %v4887_v36 }
 0x586   : > { %3513 = vrcp.f32 %v2160_v7  ;;  %v4950_v5 = vadd.f32 %v2942_v20, %v2191_v47 }
 0x587   : > { %v3504_v9 = vpop.eup %3503  ;;  %v4952_v62 = vadd.f32 %v2939_v19, %v2190_v30 }
 0x588   : > { %v3506_v3 = vpop.eup %3505  ;;  %2261 = vmax.xlane.f32.xlu0 %v4950_v5  ;;  %v2166_v50 = vpop.xlane.xlu0 %2165  ;;  %v2193_v16 = vmul.f32 %v3504_v9, %v4897_v17 }
 0x589   : > { %v2164_v38 = vpop.xlane.xlu1 %2163  ;;  %3515 = vrcp.f32 %v2166_v50  ;;  %2259 = vmax.xlane.f32.xlu1 %v4952_v62  ;;  %v2192_v36 = vmul.f32 %v3506_v3, %v4895_v0 }
 0x58a   : > { %3517 = vrcp.f32 %v2164_v38  ;;  %v4959_v53 = vadd.f32 %v2946_v60, %v2193_v16 }
 0x58b   : > { %v3508_v33 = vpop.eup %3507  ;;  %v4961_v15 = vadd.f32 %v2943_v26, %v2192_v36 }
 0x58c   : > { %v3510_v48 = vpop.eup %3509  ;;  %2265 = vmax.xlane.f32.xlu0 %v4959_v53  ;;  %v2195_v17 = vmul.f32 %v3508_v33, %v4904_v59 }
 0x58d   : > { %v2168_v27 = vpop.xlane.xlu1 %2167  ;;  %2263 = vmax.xlane.f32.xlu1 %v4961_v15  ;;  %v2194_v0 = vmul.f32 %v3510_v48, %v4902_v41  ;;  %v2958_v41 = vunpack.c.l.bf16 %v3013_v42 }
 0x58e   : > { %3519 = vrcp.f32 %v2168_v27  ;;  %v4968_v23 = vadd.f32 %v2950_v18, %v2195_v17 }
 0x58f   : > { %v3512_v22 = vpop.eup %3511  ;;  %v4970_v63 = vadd.f32 %v2947_v45, %v2194_v0 }
 0x590   : > { %v3514_v39 = vpop.eup %3513  ;;  %2269 = vmax.xlane.f32.xlu0 %v4968_v23  ;;  %v2197_v6 = vmul.f32 %v3512_v22, %v4910_v55 }
 0x591   : > { %2267 = vmax.xlane.f32.xlu1 %v4970_v63  ;;  %v2196_v59 = vmul.f32 %v3514_v39, %v4908_v52  ;;  %v2959_v52 = vunpack.c.h.bf16 %v3013_v42 }
 0x592   : > { %v4977_v37 = vadd.f32 %v2954_v56, %v2197_v6 }
 0x593   : > { %v3516_v25 = vpop.eup %3515  ;;  %v4979_v13 = vadd.f32 %v2951_v34, %v2196_v59 }
 0x594   : > { %v3518_v12 = vpop.eup %3517  ;;  %2273 = vmax.xlane.f32.xlu0 %v4977_v37  ;;  %v2199_v1 = vmul.f32 %v3516_v25, %v4916_v44  ;;  %v1873_v44 = vld [vmem:[%s4996_s20 + $0x30] sm:$0xff] }
 0x595   : > { %2271 = vmax.xlane.f32.xlu1 %v4979_v13  ;;  %v2198_v55 = vmul.f32 %v3518_v12, %v4914_v58  ;;  %v1872_v58 = vld [vmem:[%s4996_s20] sm:$0xff] }
 0x596   : > { %v4985_v4 = vadd.f32 %v2958_v41, %v2199_v1  ;;  %3085 = vmatprep.subr.bf16.mxu1 %v1872_v58 }
 0x597   : > { %v4987_v51 = vadd.f32 %v2955_v57, %v2198_v55  ;;  %3086 = vmatpush3.bf16.msra.mxu1 %v1872_v58 }
 0x598   : > { %v3520_v40 = vpop.eup %3519  ;;  %2277 = vmax.xlane.f32.xlu0 %v4985_v4  ;;  %3087 = vmatprep.subr.bf16.mxu1 %v1873_v44 }
 0x599   : > { %v2200_v43 = vmul.f32 %v3520_v40, %v4920_v49  ;;  %2275 = vmax.xlane.f32.xlu1 %v4987_v51  ;;  %v1874_v49 = vld [vmem:[%s4996_s20 + $0x60] sm:$0xff] }
 0x59b   : > { %v4992_v2 = vadd.f32 %v2959_v52, %v2200_v43  ;;  %3088 = vmatpush3.bf16.msra.mxu1 %v1873_v44 }
 0x59c   : > { %3089 = vmatprep.subr.bf16.mxu1 %v1874_v49 }
 0x59d   : > { %2279 = vmax.xlane.f32.xlu1 %v4992_v2 }
 0x59f   : > { %3090 = vmatpush3.bf16.msra.mxu1 %v1874_v49  ;;  %v1877_v49 = vld [vmem:[%s4996_s20 + $0xf0] sm:$0xff] }
 0x609   : > { %v2250_v46 = vpop.xlane.xlu0 %2249 }
 0x60a   : > { %v2281_v11 = vsub.f32 %v4926_v29, %v2250_v46 }
 0x60c   : > { %v2297_v28 = vmul.f32 1.442695, %v2281_v11  ;;  %v1878_v11 = vld [vmem:[%s4996_s20 + $0x120] sm:$0xff] }
 0x60d   : > { %v2254_v20 = vpop.xlane.xlu0 %2253 }
 0x60e   : > { %3521 = vpow2.f32 %v2297_v28  ;;  %v2283_v14 = vsub.f32 %v4932_v8, %v2254_v20  ;;  %v2252_v19 = vpop.xlane.xlu1 %2251  ;;  %v1879_v20 = vld [vmem:[%s4996_s20 + $0x150] sm:$0xff] }
 0x60f   : > { %v2282_v61 = vsub.f32 %v4934_v32, %v2252_v19 }
 0x610   : > { %v2301_v21 = vmul.f32 1.442695, %v2283_v14 }
 0x611   : > { %v2299_v35 = vmul.f32 1.442695, %v2282_v61  ;;  %v2258_v7 = vpop.xlane.xlu0 %2257 }
 0x612   : > { %3523 = vpow2.f32 %v2301_v21  ;;  %v2285_v47 = vsub.f32 %v4941_v10, %v2258_v7  ;;  %v2256_v30 = vpop.xlane.xlu1 %2255 }
 0x613   : > { %3525 = vpow2.f32 %v2299_v35  ;;  %v2284_v60 = vsub.f32 %v4943_v31, %v2256_v30 }
 0x614   : > { %v2305_v9 = vmul.f32 1.442695, %v2285_v47 }
 0x615   : > { %v2303_v29 = vmul.f32 1.442695, %v2284_v60  ;;  %v2262_v26 = vpop.xlane.xlu0 %2261 }
 0x616   : > { %3527 = vpow2.f32 %v2305_v9  ;;  %v2287_v24 = vsub.f32 %v4950_v5, %v2262_v26  ;;  %v2260_v8 = vpop.xlane.xlu1 %2259 }
 0x617   : > { %3529 = vpow2.f32 %v2303_v29  ;;  %v2286_v32 = vsub.f32 %v4952_v62, %v2260_v8 }
 0x618   : > { %v5008_v3 = vpop.eup %3521  ;;  %v2309_v50 = vmul.f32 1.442695, %v2287_v24 }
 0x619   : > { %v2307_v38 = vmul.f32 1.442695, %v2286_v32  ;;  %2329 = vadd.xlane.f32.xlu0 %v5008_v3  ;;  %v2266_v10 = vpop.xlane.xlu0 %2265 }
 0x61a   : > { %3531 = vpow2.f32 %v2309_v50  ;;  %v2289_v31 = vsub.f32 %v4959_v53, %v2266_v10  ;;  %v2264_v16 = vpop.xlane.xlu1 %2263 }
 0x61b   : > { %3533 = vpow2.f32 %v2307_v38  ;;  %v2288_v36 = vsub.f32 %v4961_v15, %v2264_v16 }
 0x61c   : > { %v5013_v18 = vpop.eup %3523  ;;  %v2313_v5 = vmul.f32 1.442695, %v2289_v31 }
 0x61d   : > { %v5015_v33 = vpop.eup %3525  ;;  %v2311_v62 = vmul.f32 1.442695, %v2288_v36  ;;  %2333 = vadd.xlane.f32.xlu0 %v5013_v18  ;;  %v2270_v45 = vpop.xlane.xlu0 %2269 }
 0x61e   : > { %3535 = vpow2.f32 %v2313_v5  ;;  %v2291_v54 = vsub.f32 %v4968_v23, %v2270_v45  ;;  %2331 = vadd.xlane.f32.xlu1 %v5015_v33  ;;  %v2268_v48 = vpop.xlane.xlu1 %2267 }
 0x61f   : > { %3537 = vpow2.f32 %v2311_v62  ;;  %v2290_v53 = vsub.f32 %v4970_v63, %v2268_v48 }
 0x620   : > { %v5021_v27 = vpop.eup %3527  ;;  %v2317_v15 = vmul.f32 1.442695, %v2291_v54 }
 0x621   : > { %v5023_v17 = vpop.eup %3529  ;;  %v2315_v0 = vmul.f32 1.442695, %v2290_v53  ;;  %2337 = vadd.xlane.f32.xlu0 %v5021_v27  ;;  %v2274_v56 = vpop.xlane.xlu0 %2273 }
 0x622   : > { %3539 = vpow2.f32 %v2317_v15  ;;  %v2293_v22 = vsub.f32 %v4977_v37, %v2274_v56  ;;  %2335 = vadd.xlane.f32.xlu1 %v5023_v17  ;;  %v2272_v23 = vpop.xlane.xlu1 %2271 }
 0x623   : > { %3541 = vpow2.f32 %v2315_v0  ;;  %v2292_v34 = vsub.f32 %v4979_v13, %v2272_v23  ;;  %v1875_v13 = vld [vmem:[%s4996_s20 + $0x90] sm:$0xff] }
 0x624   : > { %v5029_v63 = vpop.eup %3531  ;;  %v2321_v42 = vmul.f32 1.442695, %v2293_v22  ;;  %3091 = vmatprep.subr.bf16.mxu1 %v1875_v13 }
 0x625   : > { %v5031_v39 = vpop.eup %3533  ;;  %v2319_v6 = vmul.f32 1.442695, %v2292_v34  ;;  %2341 = vadd.xlane.f32.xlu0 %v5029_v63  ;;  %v2278_v59 = vpop.xlane.xlu0 %2277  ;;  %3092 = vmatpush3.bf16.msra.mxu1 %v1875_v13 }
 0x626   : > { %3543 = vpow2.f32 %v2321_v42  ;;  %v2295_v41 = vsub.f32 %v4985_v4, %v2278_v59  ;;  %2339 = vadd.xlane.f32.xlu1 %v5031_v39  ;;  %v2276_v37 = vpop.xlane.xlu1 %2275 }
 0x627   : > { %3545 = vpow2.f32 %v2319_v6  ;;  %v2294_v25 = vsub.f32 %v4987_v51, %v2276_v37  ;;  %v1876_v51 = vld [vmem:[%s4996_s20 + $0xc0] sm:$0xff] }
 0x628   : > { %v5038_v57 = vpop.eup %3535  ;;  %v2325_v12 = vmul.f32 1.442695, %v2295_v41  ;;  %3093 = vmatprep.subr.bf16.mxu1 %v1876_v51 }
 0x629   : > { %v5040_v1 = vpop.eup %3537  ;;  %v2323_v55 = vmul.f32 1.442695, %v2294_v25  ;;  %2345 = vadd.xlane.f32.xlu0 %v5038_v57  ;;  %3094 = vmatpush3.bf16.msra.mxu1 %v1876_v51 }
 0x62a   : > { %3547 = vpow2.f32 %v2325_v12  ;;  %2343 = vadd.xlane.f32.xlu1 %v5040_v1  ;;  %v2280_v4 = vpop.xlane.xlu1 %2279  ;;  %3095 = vmatprep.subr.bf16.mxu1 %v1877_v49 }
 0x62b   : > { %3549 = vpow2.f32 %v2323_v55  ;;  %v2296_v52 = vsub.f32 %v4992_v2, %v2280_v4 }
 0x62c   : > { %v5045_v40 = vpop.eup %3539 }
 0x62d   : > { %v5048_v43 = vpop.eup %3541  ;;  %v2327_v58 = vmul.f32 1.442695, %v2296_v52  ;;  %2349 = vadd.xlane.f32.xlu0 %v5045_v40  ;;  %3096 = vmatpush3.bf16.msra.mxu1 %v1877_v49 }
 0x62e   : > { %2347 = vadd.xlane.f32.xlu1 %v5048_v43  ;;  %3097 = vmatprep.subr.bf16.mxu1 %v1878_v11 }
 0x62f   : > { %3551 = vpow2.f32 %v2327_v58 }
 0x630   : > { %v5052_v44 = vpop.eup %3543 }
 0x631   : > { %v5055_v46 = vpop.eup %3545  ;;  %2353 = vadd.xlane.f32.xlu0 %v5052_v44  ;;  %3098 = vmatpush3.bf16.msra.mxu1 %v1878_v11 }
 0x632   : > { %2351 = vadd.xlane.f32.xlu1 %v5055_v46  ;;  %3099 = vmatprep.subr.bf16.mxu1 %v1879_v20 }
 0x634   : > { %v5059_v2 = vpop.eup %3547 }
 0x635   : > { %v5062_v28 = vpop.eup %3549  ;;  %2357 = vadd.xlane.f32.xlu0 %v5059_v2  ;;  %3100 = vmatpush3.bf16.msra.mxu1 %v1879_v20 }
 0x636   : > { %2355 = vadd.xlane.f32.xlu1 %v5062_v28 }
 0x639   : > { %v5067_v14 = vpop.eup %3551 }
 0x63a   : > { %2359 = vadd.xlane.f32.xlu1 %v5067_v14 }
 0x6a6   : > { %v2330_v19 = vpop.xlane.xlu0 %2329 }
 0x6a7   : > { %3553 = vrcp.f32 %v2330_v19 }
 0x6aa   : > { %v2334_v61 = vpop.xlane.xlu0 %2333 }
 0x6ab   : > { %v2332_v21 = vpop.xlane.xlu1 %2331 }
 0x6ac   : > { %3555 = vrcp.f32 %v2332_v21 }
 0x6ad   : > { %3557 = vrcp.f32 %v2334_v61 }
 0x6ae   : > { %v2338_v35 = vpop.xlane.xlu0 %2337 }
 0x6af   : > { %v2336_v7 = vpop.xlane.xlu1 %2335 }
 0x6b0   : > { %3559 = vrcp.f32 %v2336_v7 }
 0x6b1   : > { %3561 = vrcp.f32 %v2338_v35  ;;  %v3554_v60 = vpop.eup %3553 }
 0x6b2   : > { %v2342_v47 = vpop.xlane.xlu0 %2341  ;;  %v2362_v24 = vmul.f32 %v3554_v60, %v5008_v3 }
 0x6b3   : > { %v2340_v30 = vpop.xlane.xlu1 %2339 }
 0x6b4   : > { %3563 = vrcp.f32 %v2340_v30 }
 0x6b5   : > { %3565 = vrcp.f32 %v2342_v47 }
 0x6b6   : > { %v3556_v9 = vpop.eup %3555  ;;  %v2346_v29 = vpop.xlane.xlu0 %2345 }
 0x6b7   : > { %v2344_v26 = vpop.xlane.xlu1 %2343  ;;  %v2364_v8 = vmul.f32 %v3556_v9, %v5015_v33  ;;  %v3558_v32 = vpop.eup %3557 }
 0x6b8   : > { %3567 = vrcp.f32 %v2344_v26  ;;  %v2366_v16 = vmul.f32 %v3558_v32, %v5013_v18 }
 0x6b9   : > { %v2393_v50 = vpack.c.bf16 %v2364_v8, %v2362_v24  ;;  %3569 = vrcp.f32 %v2346_v29 }
 0x6ba   : > { %v3560_v38 = vpop.eup %3559  ;;  %v2350_v10 = vpop.xlane.xlu0 %2349 }
 0x6bb   : > { %3101 = vmatprep.mubr.bf16.mxu1 %v2393_v50  ;;  %v2348_v31 = vpop.xlane.xlu1 %2347  ;;  %v2368_v36 = vmul.f32 %v3560_v38, %v5023_v17  ;;  %v3562_v5 = vpop.eup %3561 }
 0x6bc   : > { %3571 = vrcp.f32 %v2348_v31  ;;  %v2370_v54 = vmul.f32 %v3562_v5, %v5021_v27 }
 0x6bd   : > { %v2394_v62 = vpack.c.bf16 %v2368_v36, %v2366_v16  ;;  %3573 = vrcp.f32 %v2350_v10 }
 0x6be   : > { %v3564_v45 = vpop.eup %3563  ;;  %v2354_v3 = vpop.xlane.xlu0 %2353 }
 0x6bf   : > { %3102 = vmatmul.mubr.bf16.vlgmr.msra.gmra.mrb[0].mxu1 %v2394_v62  ;;  %v2352_v33 = vpop.xlane.xlu1 %2351  ;;  %v2372_v48 = vmul.f32 %v3564_v45, %v5031_v39  ;;  %v3566_v53 = vpop.eup %3565 }
 0x6c0   : > { %3575 = vrcp.f32 %v2352_v33  ;;  %v2374_v56 = vmul.f32 %v3566_v53, %v5029_v63 }
 0x6c1   : > { %v2395_v15 = vpack.c.bf16 %v2372_v48, %v2370_v54  ;;  %3577 = vrcp.f32 %v2354_v3 }
 0x6c2   : > { %v3568_v0 = vpop.eup %3567  ;;  %v2358_v18 = vpop.xlane.xlu0 %2357 }
 0x6c3   : > { %3105 = vmatprep.mubr.bf16.mxu1 %v2395_v15  ;;  %v2356_v17 = vpop.xlane.xlu1 %2355  ;;  %v2376_v22 = vmul.f32 %v3568_v0, %v5040_v1  ;;  %v3570_v23 = vpop.eup %3569 }
 0x6c4   : > { %3579 = vrcp.f32 %v2356_v17  ;;  %v2378_v39 = vmul.f32 %v3570_v23, %v5038_v57 }
 0x6c5   : > { %v2396_v34 = vpack.c.bf16 %v2376_v22, %v2374_v56  ;;  %3581 = vrcp.f32 %v2358_v18 }
 0x6c6   : > { %v3572_v42 = vpop.eup %3571 }
 0x6c7   : > { %3106 = vmatmul.mubr.bf16.gmra.mrb[4].mxu1 %v2396_v34  ;;  %v2360_v27 = vpop.xlane.xlu1 %2359  ;;  %v2380_v6 = vmul.f32 %v3572_v42, %v5048_v43  ;;  %v3574_v59 = vpop.eup %3573 }
 0x6c8   : > { %3583 = vrcp.f32 %v2360_v27  ;;  %v2382_v63 = vmul.f32 %v3574_v59, %v5045_v40 }
 0x6c9   : > { %v2397_v41 = vpack.c.bf16 %v2380_v6, %v2378_v39 }
 0x6ca   : > { %v3576_v37 = vpop.eup %3575 }
 0x6cb   : > { %3109 = vmatprep.mubr.bf16.mxu1 %v2397_v41  ;;  %v2384_v25 = vmul.f32 %v3576_v37, %v5055_v46  ;;  %v3578_v13 = vpop.eup %3577 }
 0x6cc   : > { %v2386_v55 = vmul.f32 %v3578_v13, %v5052_v44 }
 0x6cd   : > { %v2398_v12 = vpack.c.bf16 %v2384_v25, %v2382_v63 }
 0x6ce   : > { %v3580_v1 = vpop.eup %3579 }
 0x6cf   : > { %3110 = vmatmul.mubr.bf16.gmra.mrb[8].mxu1 %v2398_v12  ;;  %v2388_v57 = vmul.f32 %v3580_v1, %v5062_v28  ;;  %v3582_v4 = vpop.eup %3581 }
 0x6d0   : > { %v2390_v43 = vmul.f32 %v3582_v4, %v5059_v2 }
 0x6d1   : > { %v2399_v52 = vpack.c.bf16 %v2388_v57, %v2386_v55 }
 0x6d2   : > { %v3584_v51 = vpop.eup %3583 }
 0x6d3   : > { %3113 = vmatprep.mubr.bf16.mxu1 %v2399_v52  ;;  %v2392_v40 = vmul.f32 %v3584_v51, %v5067_v14 }
 0x6d5   : > { %v2400_v58 = vpack.c.bf16 %v2392_v40, %v2390_v43 }
 0x6d7   : > { %3114 = vmatmul.mubr.bf16.gmra.mrb[12].mxu1 %v2400_v58 }
 0x792   : > { %v3103_v49 = vpop.f32.mrb[0].mxu1 }
 0x793   : > { %v2435_v46 = vpop.f32.mrb[1].mxu1 }
 0x794   : > { %v3104_v11 = vpop.f32.mrb[2].mxu1 }
 0x795   : > { %v2968_v44 = vpack.c.bf16 %v3104_v11, %v3103_v49  ;;  %v2438_v20 = vpop.f32.mrb[3].mxu1 }
 0x796   : > { %v2963_v28 = vpack.c.bf16 %v2438_v20, %v2435_v46 }
 0x797   : > { %3014 = vst [vmem:[%s4185_s17 + $0x8] sm:$0xff] %v2968_v44  }
 0x798   : > { %2964 = vst [vmem:[%s4185_s17] sm:$0xff] %v2963_v28  }
 0x79a   : > { %v3107_v19 = vpop.f32.mrb[4].mxu1 }
 0x79b   : > { %v2451_v61 = vpop.f32.mrb[5].mxu1 }
 0x79c   : > { %v3108_v2 = vpop.f32.mrb[6].mxu1 }
 0x79d   : > { %v2978_v14 = vpack.c.bf16 %v3108_v2, %v3107_v19  ;;  %v2454_v21 = vpop.f32.mrb[7].mxu1 }
 0x79e   : > { %v2973_v35 = vpack.c.bf16 %v2454_v21, %v2451_v61 }
 0x79f   : > { %3016 = vst [vmem:[%s4185_s17 + $0x18] sm:$0xff] %v2978_v14  }
 0x7a0   : > { %3015 = vst [vmem:[%s4185_s17 + $0x10] sm:$0xff] %v2973_v35  }
 0x7a2   : > { %v3111_v7 = vpop.f32.mrb[8].mxu1 }
 0x7a3   : > { %v2467_v47 = vpop.f32.mrb[9].mxu1 }
 0x7a4   : > { %v3112_v30 = vpop.f32.mrb[10].mxu1 }
 0x7a5   : > { %v2988_v60 = vpack.c.bf16 %v3112_v30, %v3111_v7  ;;  %v2470_v9 = vpop.f32.mrb[11].mxu1 }
 0x7a6   : > { %v2983_v29 = vpack.c.bf16 %v2470_v9, %v2467_v47 }
 0x7a7   : > { %3018 = vst [vmem:[%s4185_s17 + $0x28] sm:$0xff] %v2988_v60  }
 0x7a8   : > { %3017 = vst [vmem:[%s4185_s17 + $0x20] sm:$0xff] %v2983_v29  }
 0x7aa   : > { %v3115_v26 = vpop.f32.mrb[12].mxu1 }
 0x7ab   : > { %v2483_v24 = vpop.f32.mrb[13].mxu1 }
 0x7ac   : > { %v3116_v8 = vpop.f32.mrb[14].mxu1 }
 0x7ad   : > { %v2998_v32 = vpack.c.bf16 %v3116_v8, %v3115_v26  ;;  %v2486_v50 = vpop.f32.mrb[15].mxu1 }
 0x7ae   : > { %v2993_v38 = vpack.c.bf16 %v2486_v50, %v2483_v24 }
 0x7af   : > { %3020 = vst [vmem:[%s4185_s17 + $0x38] sm:$0xff] %v2998_v32  }
 0x7b0   : > { %3019 = vst [vmem:[%s4185_s17 + $0x30] sm:$0xff] %v2993_v38  }
 0x7b1   : > { %3716 = shalt.err (!%p3713_p10)
}
 0x7b2   : > { %s3717_s12 = scalar_lea.hbm %s5098_s8, 1024  ;;  %s3721_s16 = scalar_lea.hbm %s5225_s7, 4096 }
 0x7b3   : > { %p3718_p8 = scmp.ne.s32.totalorder %s5098_s8, %s3717_s12  ;;  %p3722_p1 = scmp.lt.u32.totalorder %s5098_s8, %s5225_s7 }
 0x7b4   : > { %p3723_p11 = scmp.lt.u32.totalorder %s3721_s16, %s3717_s12  ;;  %p3725_p7 = scmp.lt.u32.totalorder %s3717_s12, %s5098_s8 }
 0x7b5   : > { %p3719_p3 = pnand %p3718_p8, %p5226_p9 }
 0x7b6   : > { %p3724_p0 = por %p3723_p11, %p3722_p1 }
 0x7b7   : > { %p3720_p13 = pneg %p3719_p3 }
 0x7b8   : > { %p3726_p12 = por %p3725_p7, %p3724_p0 }
 0x7ba   : > { %p3727_p2 = pnand %p3726_p12, %p3720_p13 }
 0x7bc   : > { %3730 = shalt.err (!%p3727_p2)
}
 0x7bd   : > { %s3846_s20 = smov 64   ;;  %s3847_s19 = smov 128  }
 0x7be   : > { %s3848_s5 = smov 4  }
 0x7bf   : > { %3159 = dma.vmem_to_hbm [thread:$0]  (%p5226_p9), %s5100_s26, 1024, %s5098_s8, %s5106_s30, %s3846_s20, %s3847_s19, %s3848_s5  }
 0x7c0 PF: > { %s5227_s9 = sld [smem:[#allocation23_spill]]  ;;  %p3182_p5 = scmp.ge.s32.totalorder %s3833_s11, 2 }
 0x7c1   : > { %s2608_s15 = sand.u32 1, %s3793_s24  }
 0x7c2   : > { %s2609_s29 = scalar_lea.sflag [#allocation5], %s2608_s15 }
 0x7c6   : > { %p5228_p4 = scmp.ne.s32.totalorder %s5227_s9, 0 }
 0x7c8   : > { %p3176_p6 = pnand %p3182_p5, %p5228_p4 }
 0x7ca   : > { %3788 = dma.done.wait (!%p3176_p6), %s2609_s29, 1024  }
 0x7cb   : > { %3790 = vsyncadd (!%p3176_p6), %s2609_s29, 4294966272  ;;  %s24_s11 = sadd.s32 1, %s3833_s11   ;;  %s5229_s18 = sld [smem:[#allocation15_spill]] }
 0x7cc   : > { %p21_p10 = scmp.ge.s32.totalorder %s24_s11, 6   ;;  %s5230_s26 = sld [smem:[#allocation22_spill]] }
 0x7cd   : > { %s5231_s23 = sld [smem:[#allocation16_spill]]  ;;  %s5232_s29 = sld [smem:[#allocation21_spill]] }
 0x7ce   : > { %s5233_s30 = sld [smem:[#allocation18_spill]]  ;;  %s5234_s9 = sld [smem:[#allocation19_spill]] }
 0x7cf   : > { %s5235_s0 = sld [smem:[#allocation20_spill]]  ;;  %s5236_s24 = smov %s3797_s25 }
 0x7d0   : > { %s5238_s27 = smov %s3809_s28  ;;  %s5240_s8 = smov %s3829_s10 }
 0x7d1   : > { %s5237_s25 = smov %s5229_s18  ;;  %23 = sbr.rel (!%p21_p10) target bundleno = 15 (0xf), region = 126 }
 0x7d3   : > { %s5239_s28 = smov %s5231_s23 }
 0x7d5   : > { %s5241_s10 = smov %s5235_s0 }
 0x7d8   :  { %2614 = vsyncpa [#allocation4], 1 }
 0x7d9   :  { %2616 = vsyncpa [#allocation4 + $0x1], 1 }
 0x7da   :  { %2617 = vsyncpa [#allocation7], 1 }
 0x7db   :  { %2618 = vsyncpa [#allocation5], 1 }
 0x7dc   :  { %2620 = vsyncpa [#allocation5 + $0x1], 1 }

</bundles_post_ra>
